<compile_context>
chip_gen: v7x
topology: tpu7x:2x2x1
jax: 0.10.0
libtpu: 0.0.40
codegen_flags: <defaults>
</compile_context>

<pallas_src>
import functools

import jax
import jax.numpy as jnp
import numpy as np
from jax.experimental import pallas as pl
from jax.experimental.pallas import tpu as pltpu

LN_EPS = 1e-5  # PyTorch nn.LayerNorm default


def _layernorm(h, g, b):
    mu = jnp.mean(h, axis=-1, keepdims=True)
    var = jnp.mean((h - mu) ** 2, axis=-1, keepdims=True)
    return (h - mu) * jax.lax.rsqrt(var + LN_EPS) * g + b


def fused_bytenet_kernel(n_layers, kernel_size, dilations, n_tokens, pad_max,
                         *refs):
    """refs = (tokens, emb_table, [12 refs per layer]*n_layers, out, conv_buf)."""
    tok_ref = refs[0]                                  # (1, L, 1) int32
    emb_ref = refs[1]                                  # (n_tokens, d_model) f32
    o_ref = refs[2 + 12 * n_layers]                    # (1, L, d_model) f32
    buf = refs[3 + 12 * n_layers]                      # (L + 2*pad_max, d_h) f32

    L = tok_ref.shape[1]

    # Zero the scratch once per grid step; its borders are never overwritten and
    # provide the Conv1d "same" zero padding (= the sequence-boundary masking).
    buf[...] = jnp.zeros(buf.shape, jnp.float32)

    # _embed: nn.Embedding gather as an exact 0/1 one-hot matmul on the MXU.
    tok = tok_ref[0, :, :]                                        # (L, 1) int32
    iota = jax.lax.broadcasted_iota(jnp.int32, (L, n_tokens), 1)  # (L, n_tokens)
    onehot = jnp.where(tok == iota, 1.0, 0.0).astype(jnp.float32)
    x = jnp.dot(onehot, emb_ref[...],
                preferred_element_type=jnp.float32)               # (L, d_model)

    for layer in range(n_layers):
        base = 2 + 12 * layer
        (ln1g, ln1b, w1, b1,
         ln2g, ln2b, wc, bc,
         ln3g, ln3b, w2, b2) = refs[base:base + 12]
        dil = dilations[layer]
        pad = dil * (kernel_size - 1) // 2

        # sequence1: LN -> ReLU -> PFF(d_model -> d_h) -> LN -> ReLU   (f32 math)
        h = jnp.maximum(_layernorm(x, ln1g[...], ln1b[...]), 0.0)
        h = jnp.dot(h.astype(jnp.bfloat16), w1[...],
                    preferred_element_type=jnp.float32) + b1[...]
        h = jnp.maximum(_layernorm(h, ln2g[...], ln2b[...]), 0.0)     # (L, d_h)

        # Dilated MaskedConv1d ("same" padding): write h into the zero-padded
        # scratch, read each tap as a static-offset slice (no MXU row-select),
        # then k independent tiny tap@wc matmuls accumulated in f32.
        buf[pl.ds(pad_max, L), :] = h
        taps = [buf[pl.ds(pad_max + j * dil - pad, L), :].astype(jnp.bfloat16)
                for j in range(kernel_size)]                      # all loads first
        conv = None
        for j in range(kernel_size):
            part = jnp.dot(taps[j], wc[j],
                           preferred_element_type=jnp.float32)
            conv = part if conv is None else conv + part
        conv = conv + bc[...]                                     # bias added once

        # sequence2: LN -> ReLU -> PFF(d_h -> d_model), then residual.
        g = jnp.maximum(_layernorm(conv, ln3g[...], ln3b[...]), 0.0)
        g = jnp.dot(g.astype(jnp.bfloat16), w2[...],
                    preferred_element_type=jnp.float32) + b2[...]
        x = x + g

    o_ref[0, :, :] = x.astype(o_ref.dtype)


def _zero_index_map(ndim):
    return lambda b: (0,) * ndim


def nano_bytenet_time_forward(tokens, emb_table, block_params, kernel_size, dilations):
    """tokens: (N, L) int32 -> (N, L, d_model) float32. One pallas_call total."""
    N, L = tokens.shape
    n_tokens, d_model = emb_table.shape
    n_layers = len(block_params)
    d_h = block_params[0]["w1"].shape[1]
    pad_max = max(dilations) * (kernel_size - 1) // 2

    tokens3d = tokens.reshape(N, L, 1).astype(jnp.int32)

    flat_inputs = [tokens3d, emb_table]
    in_specs = [pl.BlockSpec((1, L, 1), lambda b: (b, 0, 0)),
                pl.BlockSpec((n_tokens, d_model), _zero_index_map(2))]
    for p in block_params:
        layer_inputs = [p["ln1g"], p["ln1b"], p["w1"], p["b1"],
                        p["ln2g"], p["ln2b"], p["wc"], p["bc"],
                        p["ln3g"], p["ln3b"], p["w2"], p["b2"]]
        flat_inputs += layer_inputs
        in_specs += [pl.BlockSpec(q.shape, _zero_index_map(q.ndim)) for q in layer_inputs]

    # Advisory scheduling hint for XLA.
    flops = N * (2 * L * n_tokens * d_model
                 + n_layers * 2 * L * (d_model * d_h
                                       + kernel_size * d_h * d_h
                                       + d_h * d_model))
    transcendentals = N * L * 3 * n_layers                    # one rsqrt per LN row
    bytes_accessed = (sum(int(np.prod(a.shape)) * a.dtype.itemsize for a in flat_inputs)
                      + N * L * d_model * 4)

    kern = functools.partial(fused_bytenet_kernel, n_layers, kernel_size,
                             tuple(int(d) for d in dilations), n_tokens, pad_max)
    out = pl.pallas_call(
        kern,
        out_shape=jax.ShapeDtypeStruct((N, L, d_model), jnp.float32),
        grid_spec=pltpu.PrefetchScalarGridSpec(
            num_scalar_prefetch=0,
            grid=(N,),                                    # one sequence per grid step
            in_specs=in_specs,
            out_specs=pl.BlockSpec((1, L, d_model), lambda b: (b, 0, 0)),
            scratch_shapes=[pltpu.VMEM((L + 2 * pad_max, d_h), jnp.float32)],
        ),
        compiler_params=pltpu.CompilerParams(dimension_semantics=("parallel",)),
        cost_estimate=pl.CostEstimate(flops=flops,
                                      transcendentals=transcendentals,
                                      bytes_accessed=bytes_accessed),
    )(*flat_inputs)
    return out


# ------------------------- pure-JAX reference (sanity check) ----------------
def _block_ref(x, p, kernel_size, dilation):
    L = x.shape[1]
    pad = dilation * (kernel_size - 1) // 2
    h = jnp.maximum(_layernorm(x, p["ln1g"], p["ln1b"]), 0.0)
    h = jnp.einsum("blc,ch->blh", h.astype(jnp.bfloat16), p["w1"],
                   preferred_element_type=jnp.float32) + p["b1"]
    h = jnp.maximum(_layernorm(h, p["ln2g"], p["ln2b"]), 0.0)
    h_bf = h.astype(jnp.bfloat16)
    hp = jnp.pad(h_bf, ((0, 0), (pad, pad), (0, 0)))
    conv = None
    for j in range(kernel_size):
        tap = hp[:, j * dilation:j * dilation + L, :]
        part = jnp.einsum("blh,hg->blg", tap, p["wc"][j],
                          preferred_element_type=jnp.float32)
        conv = part if conv is None else conv + part
    conv = conv + p["bc"]
    h = jnp.maximum(_layernorm(conv, p["ln3g"], p["ln3b"]), 0.0)
    h = jnp.einsum("blh,hc->blc", h.astype(jnp.bfloat16), p["w2"],
                   preferred_element_type=jnp.float32) + p["b2"]
    return x + h


def _forward_ref(tokens, emb_table, block_params, kernel_size, dilations):
    e = emb_table[tokens]
    for p, d in zip(block_params, dilations):
        e = _block_ref(e, p, kernel_size, d)
    return e


# ---------------------------------------------------------------------------
def make_block_params(key, d_model, d_h, kernel_size):
    ks = jax.random.split(key, 10)
    s_in = 1.0 / np.sqrt(d_model)
    s_h = 1.0 / np.sqrt(d_h)
    return {
        "ln1g": 1.0 + 0.05 * jax.random.normal(ks[4], (1, d_model), jnp.float32),
        "ln1b": 0.05 * jax.random.normal(ks[5], (1, d_model), jnp.float32),
        "w1": (jax.random.normal(ks[0], (d_model, d_h), jnp.float32) * s_in).astype(jnp.bfloat16),
        "b1": jnp.zeros((1, d_h), jnp.float32),
        "ln2g": 1.0 + 0.05 * jax.random.normal(ks[6], (1, d_h), jnp.float32),
        "ln2b": 0.05 * jax.random.normal(ks[7], (1, d_h), jnp.float32),
        "wc": (jax.random.normal(ks[1], (kernel_size, d_h, d_h), jnp.float32) * s_h).astype(jnp.bfloat16),
        "bc": jax.random.normal(ks[2], (1, d_h), jnp.float32) * 0.01,
        "ln3g": 1.0 + 0.05 * jax.random.normal(ks[8], (1, d_h), jnp.float32),
        "ln3b": 0.05 * jax.random.normal(ks[9], (1, d_h), jnp.float32),
        "w2": (jax.random.normal(ks[3], (d_h, d_model), jnp.float32) * s_h).astype(jnp.bfloat16),
        "b2": jnp.zeros((1, d_model), jnp.float32),
    }


if __name__ == "__main__":
    # Small NanoByteNetTime config
    n_tokens = 20
    d_embedding = 32            # down_embed=False => d_model == d_embedding
    d_model = 32
    n_layers = 2
    kernel_size = 3
    r = 2
    slim = True
    d_h = d_model // 2 if slim else d_model

    log2 = int(np.log2(r)) + 1
    dilations = [2 ** (n % log2) for n in range(n_layers)]   # [1, 2]

    batch, length = 2, 16

    key = jax.random.PRNGKey(0)
    k_tok, k_emb, *k_blocks = jax.random.split(key, 2 + n_layers)

    tokens = jax.random.randint(k_tok, (batch, length), 0, n_tokens, dtype=jnp.int32)
    emb_table = jax.random.normal(k_emb, (n_tokens, d_embedding), jnp.float32)
    block_params = [make_block_params(k, d_model, d_h, kernel_size) for k in k_blocks]

    out = nano_bytenet_time_forward(tokens, emb_table, block_params, kernel_size, dilations)
    out = jax.block_until_ready(out)

    ref = _forward_ref(tokens, emb_table, block_params, kernel_size, dilations)
    assert out.shape == (batch, length, d_model)
    np.testing.assert_allclose(np.asarray(out, dtype=np.float32),
                               np.asarray(ref, dtype=np.float32),
                               atol=1e-2, rtol=1e-2)

    print("KERNEL_OK")
</pallas_src>

<mosaic_0001>
module attributes {stable_mosaic.version = 11 : i64} {
  func.func @fused_bytenet_kernel(%arg0: i32, %arg1: memref<1x16x1xi32, #tpu.memory_space<vmem>>, %arg2: memref<20x32xf32, #tpu.memory_space<vmem>>, %arg3: memref<1x32xf32, #tpu.memory_space<vmem>>, %arg4: memref<1x32xf32, #tpu.memory_space<vmem>>, %arg5: memref<32x16xbf16, #tpu.memory_space<vmem>>, %arg6: memref<1x16xf32, #tpu.memory_space<vmem>>, %arg7: memref<1x16xf32, #tpu.memory_space<vmem>>, %arg8: memref<1x16xf32, #tpu.memory_space<vmem>>, %arg9: memref<3x16x16xbf16, #tpu.memory_space<vmem>>, %arg10: memref<1x16xf32, #tpu.memory_space<vmem>>, %arg11: memref<1x16xf32, #tpu.memory_space<vmem>>, %arg12: memref<1x16xf32, #tpu.memory_space<vmem>>, %arg13: memref<16x32xbf16, #tpu.memory_space<vmem>>, %arg14: memref<1x32xf32, #tpu.memory_space<vmem>>, %arg15: memref<1x32xf32, #tpu.memory_space<vmem>>, %arg16: memref<1x32xf32, #tpu.memory_space<vmem>>, %arg17: memref<32x16xbf16, #tpu.memory_space<vmem>>, %arg18: memref<1x16xf32, #tpu.memory_space<vmem>>, %arg19: memref<1x16xf32, #tpu.memory_space<vmem>>, %arg20: memref<1x16xf32, #tpu.memory_space<vmem>>, %arg21: memref<3x16x16xbf16, #tpu.memory_space<vmem>>, %arg22: memref<1x16xf32, #tpu.memory_space<vmem>>, %arg23: memref<1x16xf32, #tpu.memory_space<vmem>>, %arg24: memref<1x16xf32, #tpu.memory_space<vmem>>, %arg25: memref<16x32xbf16, #tpu.memory_space<vmem>>, %arg26: memref<1x32xf32, #tpu.memory_space<vmem>>, %arg27: memref<1x16x32xf32, #tpu.memory_space<vmem>>, %arg28: memref<20x16xf32, #tpu.memory_space<vmem>>) attributes {dimension_semantics = [#tpu.dimension_semantics<parallel>], iteration_bounds = array<i64: 2>, scalar_prefetch = 0 : i64, scratch_operands = 1 : i64, tpu.core_type = #tpu.core_type<tc>, window_params = [{transform_indices = @transform_0, window_bounds = array<i64: 1, 16, 1>}, {pipeline_mode = #tpu.pipeline_mode<synchronous>, transform_indices = @transform_1, window_bounds = array<i64: 20, 32>}, {pipeline_mode = #tpu.pipeline_mode<synchronous>, transform_indices = @transform_2, window_bounds = array<i64: 1, 32>}, {pipeline_mode = #tpu.pipeline_mode<synchronous>, transform_indices = @transform_3, window_bounds = array<i64: 1, 32>}, {pipeline_mode = #tpu.pipeline_mode<synchronous>, transform_indices = @transform_4, window_bounds = array<i64: 32, 16>}, {pipeline_mode = #tpu.pipeline_mode<synchronous>, transform_indices = @transform_5, window_bounds = array<i64: 1, 16>}, {pipeline_mode = #tpu.pipeline_mode<synchronous>, transform_indices = @transform_6, window_bounds = array<i64: 1, 16>}, {pipeline_mode = #tpu.pipeline_mode<synchronous>, transform_indices = @transform_7, window_bounds = array<i64: 1, 16>}, {pipeline_mode = #tpu.pipeline_mode<synchronous>, transform_indices = @transform_8, window_bounds = array<i64: 3, 16, 16>}, {pipeline_mode = #tpu.pipeline_mode<synchronous>, transform_indices = @transform_9, window_bounds = array<i64: 1, 16>}, {pipeline_mode = #tpu.pipeline_mode<synchronous>, transform_indices = @transform_10, window_bounds = array<i64: 1, 16>}, {pipeline_mode = #tpu.pipeline_mode<synchronous>, transform_indices = @transform_11, window_bounds = array<i64: 1, 16>}, {pipeline_mode = #tpu.pipeline_mode<synchronous>, transform_indices = @transform_12, window_bounds = array<i64: 16, 32>}, {pipeline_mode = #tpu.pipeline_mode<synchronous>, transform_indices = @transform_13, window_bounds = array<i64: 1, 32>}, {pipeline_mode = #tpu.pipeline_mode<synchronous>, transform_indices = @transform_14, window_bounds = array<i64: 1, 32>}, {pipeline_mode = #tpu.pipeline_mode<synchronous>, transform_indices = @transform_15, window_bounds = array<i64: 1, 32>}, {pipeline_mode = #tpu.pipeline_mode<synchronous>, transform_indices = @transform_16, window_bounds = array<i64: 32, 16>}, {pipeline_mode = #tpu.pipeline_mode<synchronous>, transform_indices = @transform_17, window_bounds = array<i64: 1, 16>}, {pipeline_mode = #tpu.pipeline_mode<synchronous>, transform_indices = @transform_18, window_bounds = array<i64: 1, 16>}, {pipeline_mode = #tpu.pipeline_mode<synchronous>, transform_indices = @transform_19, window_bounds = array<i64: 1, 16>}, {pipeline_mode = #tpu.pipeline_mode<synchronous>, transform_indices = @transform_20, window_bounds = array<i64: 3, 16, 16>}, {pipeline_mode = #tpu.pipeline_mode<synchronous>, transform_indices = @transform_21, window_bounds = array<i64: 1, 16>}, {pipeline_mode = #tpu.pipeline_mode<synchronous>, transform_indices = @transform_22, window_bounds = array<i64: 1, 16>}, {pipeline_mode = #tpu.pipeline_mode<synchronous>, transform_indices = @transform_23, window_bounds = array<i64: 1, 16>}, {pipeline_mode = #tpu.pipeline_mode<synchronous>, transform_indices = @transform_24, window_bounds = array<i64: 16, 32>}, {pipeline_mode = #tpu.pipeline_mode<synchronous>, transform_indices = @transform_25, window_bounds = array<i64: 1, 32>}, {transform_indices = @transform_26, window_bounds = array<i64: 1, 16, 32>}]} {
    %cst = arith.constant 0.000000e+00 : f32
    %0 = vector.broadcast %cst : f32 to vector<20x16xf32>
    %c0 = arith.constant 0 : index
    %c0_0 = arith.constant 0 : index
    %1 = vector.load %arg28[%c0, %c0_0] : memref<20x16xf32, #tpu.memory_space<vmem>>, vector<20x16xf32>
    tpu.vector_store %arg28[%c0, %c0_0], %0 {strides = array<i32>} : memref<20x16xf32, #tpu.memory_space<vmem>>, vector<20x16xf32>,
    %c0_1 = arith.constant 0 : index
    %c0_2 = arith.constant 0 : index
    %c0_3 = arith.constant 0 : index
    %2 = vector.load %arg1[%c0_1, %c0_2, %c0_3] : memref<1x16x1xi32, #tpu.memory_space<vmem>>, vector<1x16x1xi32>
    %3 = vector.shape_cast %2 : vector<1x16x1xi32> to vector<16x1xi32>
    %4 = tpu.iota {dimensions = array<i32: 1>} : vector<16x20xi32>
    %5 = vector.broadcast %3 : vector<16x1xi32> to vector<16x20xi32>
    %6 = arith.cmpi eq, %5, %4 : vector<16x20xi32>
    %cst_4 = arith.constant 1.000000e+00 : f32
    %cst_5 = arith.constant 0.000000e+00 : f32
    %7 = vector.broadcast %cst_4 : f32 to vector<16x20xf32>
    %8 = vector.broadcast %cst_5 : f32 to vector<16x20xf32>
    %9 = arith.select %6, %7, %8 : vector<16x20xi1>, vector<16x20xf32>
    %c0_6 = arith.constant 0 : index
    %c0_7 = arith.constant 0 : index
    %10 = vector.load %arg2[%c0_6, %c0_7] : memref<20x32xf32, #tpu.memory_space<vmem>>, vector<20x32xf32>
    %cst_8 = arith.constant dense<0.000000e+00> : vector<16x32xf32>
    %11 = tpu.matmul %9, %10, %cst_8 {dimension_numbers = #tpu.dot_dimension_numbers<[1], [0], [0], [1], [0, 0, 1, 1], [], []>} : vector<16x20xf32>, vector<20x32xf32>, vector<16x32xf32> -> vector<16x32xf32>
    %c0_9 = arith.constant 0 : index
    %c0_10 = arith.constant 0 : index
    %12 = vector.load %arg3[%c0_9, %c0_10] : memref<1x32xf32, #tpu.memory_space<vmem>>, vector<1x32xf32>
    %c0_11 = arith.constant 0 : index
    %c0_12 = arith.constant 0 : index
    %13 = vector.load %arg4[%c0_11, %c0_12] : memref<1x32xf32, #tpu.memory_space<vmem>>, vector<1x32xf32>
    %cst_13 = arith.constant dense<0.000000e+00> : vector<16xf32>
    %14 = vector.multi_reduction <add>, %11, %cst_13 [1] : vector<16x32xf32> to vector<16xf32>
    %15 = vector.shape_cast %14 : vector<16xf32> to vector<16x1xf32>
    %cst_14 = arith.constant 3.200000e+01 : f32
    %16 = vector.broadcast %cst_14 : f32 to vector<16x1xf32>
    %17 = arith.divf %15, %16 : vector<16x1xf32>
    %18 = vector.broadcast %17 : vector<16x1xf32> to vector<16x32xf32>
    %19 = arith.subf %11, %18 : vector<16x32xf32>
    %20 = arith.mulf %19, %19 : vector<16x32xf32>
    %cst_15 = arith.constant dense<0.000000e+00> : vector<16xf32>
    %21 = vector.multi_reduction <add>, %20, %cst_15 [1] : vector<16x32xf32> to vector<16xf32>
    %22 = vector.shape_cast %21 : vector<16xf32> to vector<16x1xf32>
    %cst_16 = arith.constant 3.200000e+01 : f32
    %23 = vector.broadcast %cst_16 : f32 to vector<16x1xf32>
    %24 = arith.divf %22, %23 : vector<16x1xf32>
    %25 = vector.broadcast %17 : vector<16x1xf32> to vector<16x32xf32>
    %26 = arith.subf %11, %25 : vector<16x32xf32>
    %cst_17 = arith.constant 9.99999974E-6 : f32
    %27 = vector.broadcast %cst_17 : f32 to vector<16x1xf32>
    %28 = arith.addf %24, %27 : vector<16x1xf32>
    %29 = math.rsqrt %28 : vector<16x1xf32>
    %30 = vector.broadcast %29 : vector<16x1xf32> to vector<16x32xf32>
    %31 = arith.mulf %26, %30 : vector<16x32xf32>
    %32 = vector.broadcast %12 : vector<1x32xf32> to vector<16x32xf32>
    %33 = arith.mulf %31, %32 : vector<16x32xf32>
    %34 = vector.broadcast %13 : vector<1x32xf32> to vector<16x32xf32>
    %35 = arith.addf %33, %34 : vector<16x32xf32>
    %cst_18 = arith.constant 0.000000e+00 : f32
    %36 = vector.broadcast %cst_18 : f32 to vector<16x32xf32>
    %37 = arith.maximumf %35, %36 : vector<16x32xf32>
    %38 = arith.truncf %37 : vector<16x32xf32> to vector<16x32xbf16>
    %c0_19 = arith.constant 0 : index
    %c0_20 = arith.constant 0 : index
    %39 = vector.load %arg5[%c0_19, %c0_20] : memref<32x16xbf16, #tpu.memory_space<vmem>>, vector<32x16xbf16>
    %cst_21 = arith.constant dense<0.000000e+00> : vector<16x16xf32>
    %40 = tpu.matmul %38, %39, %cst_21 {dimension_numbers = #tpu.dot_dimension_numbers<[1], [0], [0], [1], [0, 0, 1, 1], [], []>} : vector<16x32xbf16>, vector<32x16xbf16>, vector<16x16xf32> -> vector<16x16xf32>
    %c0_22 = arith.constant 0 : index
    %c0_23 = arith.constant 0 : index
    %41 = vector.load %arg6[%c0_22, %c0_23] : memref<1x16xf32, #tpu.memory_space<vmem>>, vector<1x16xf32>
    %42 = vector.broadcast %41 : vector<1x16xf32> to vector<16x16xf32>
    %43 = arith.addf %40, %42 : vector<16x16xf32>
    %c0_24 = arith.constant 0 : index
    %c0_25 = arith.constant 0 : index
    %44 = vector.load %arg7[%c0_24, %c0_25] : memref<1x16xf32, #tpu.memory_space<vmem>>, vector<1x16xf32>
    %c0_26 = arith.constant 0 : index
    %c0_27 = arith.constant 0 : index
    %45 = vector.load %arg8[%c0_26, %c0_27] : memref<1x16xf32, #tpu.memory_space<vmem>>, vector<1x16xf32>
    %cst_28 = arith.constant dense<0.000000e+00> : vector<16xf32>
    %46 = vector.multi_reduction <add>, %43, %cst_28 [1] : vector<16x16xf32> to vector<16xf32>
    %47 = vector.shape_cast %46 : vector<16xf32> to vector<16x1xf32>
    %cst_29 = arith.constant 1.600000e+01 : f32
    %48 = vector.broadcast %cst_29 : f32 to vector<16x1xf32>
    %49 = arith.divf %47, %48 : vector<16x1xf32>
    %50 = vector.broadcast %49 : vector<16x1xf32> to vector<16x16xf32>
    %51 = arith.subf %43, %50 : vector<16x16xf32>
    %52 = arith.mulf %51, %51 : vector<16x16xf32>
    %cst_30 = arith.constant dense<0.000000e+00> : vector<16xf32>
    %53 = vector.multi_reduction <add>, %52, %cst_30 [1] : vector<16x16xf32> to vector<16xf32>
    %54 = vector.shape_cast %53 : vector<16xf32> to vector<16x1xf32>
    %cst_31 = arith.constant 1.600000e+01 : f32
    %55 = vector.broadcast %cst_31 : f32 to vector<16x1xf32>
    %56 = arith.divf %54, %55 : vector<16x1xf32>
    %57 = vector.broadcast %49 : vector<16x1xf32> to vector<16x16xf32>
    %58 = arith.subf %43, %57 : vector<16x16xf32>
    %cst_32 = arith.constant 9.99999974E-6 : f32
    %59 = vector.broadcast %cst_32 : f32 to vector<16x1xf32>
    %60 = arith.addf %56, %59 : vector<16x1xf32>
    %61 = math.rsqrt %60 : vector<16x1xf32>
    %62 = vector.broadcast %61 : vector<16x1xf32> to vector<16x16xf32>
    %63 = arith.mulf %58, %62 : vector<16x16xf32>
    %64 = vector.broadcast %44 : vector<1x16xf32> to vector<16x16xf32>
    %65 = arith.mulf %63, %64 : vector<16x16xf32>
    %66 = vector.broadcast %45 : vector<1x16xf32> to vector<16x16xf32>
    %67 = arith.addf %65, %66 : vector<16x16xf32>
    %cst_33 = arith.constant 0.000000e+00 : f32
    %68 = vector.broadcast %cst_33 : f32 to vector<16x16xf32>
    %69 = arith.maximumf %67, %68 : vector<16x16xf32>
    %c2 = arith.constant 2 : index
    %c0_34 = arith.constant 0 : index
    %70 = vector.load %arg28[%c2, %c0_34] : memref<20x16xf32, #tpu.memory_space<vmem>>, vector<16x16xf32>
    tpu.vector_store %arg28[%c2, %c0_34], %69 {strides = array<i32>} : memref<20x16xf32, #tpu.memory_space<vmem>>, vector<16x16xf32>,
    %c1 = arith.constant 1 : index
    %c0_35 = arith.constant 0 : index
    %71 = vector.load %arg28[%c1, %c0_35] : memref<20x16xf32, #tpu.memory_space<vmem>>, vector<16x16xf32>
    %72 = arith.truncf %71 : vector<16x16xf32> to vector<16x16xbf16>
    %c2_36 = arith.constant 2 : index
    %c0_37 = arith.constant 0 : index
    %73 = vector.load %arg28[%c2_36, %c0_37] : memref<20x16xf32, #tpu.memory_space<vmem>>, vector<16x16xf32>
    %74 = arith.truncf %73 : vector<16x16xf32> to vector<16x16xbf16>
    %c3 = arith.constant 3 : index
    %c0_38 = arith.constant 0 : index
    %75 = vector.load %arg28[%c3, %c0_38] : memref<20x16xf32, #tpu.memory_space<vmem>>, vector<16x16xf32>
    %76 = arith.truncf %75 : vector<16x16xf32> to vector<16x16xbf16>
    %c0_39 = arith.constant 0 : index
    %c0_40 = arith.constant 0 : index
    %c0_41 = arith.constant 0 : index
    %77 = vector.load %arg9[%c0_39, %c0_40, %c0_41] : memref<3x16x16xbf16, #tpu.memory_space<vmem>>, vector<1x16x16xbf16>
    %78 = vector.shape_cast %77 : vector<1x16x16xbf16> to vector<16x16xbf16>
    %cst_42 = arith.constant dense<0.000000e+00> : vector<16x16xf32>
    %79 = tpu.matmul %72, %78, %cst_42 {dimension_numbers = #tpu.dot_dimension_numbers<[1], [0], [0], [1], [0, 0, 1, 1], [], []>} : vector<16x16xbf16>, vector<16x16xbf16>, vector<16x16xf32> -> vector<16x16xf32>
    %c1_43 = arith.constant 1 : index
    %c0_44 = arith.constant 0 : index
    %c0_45 = arith.constant 0 : index
    %80 = vector.load %arg9[%c1_43, %c0_44, %c0_45] : memref<3x16x16xbf16, #tpu.memory_space<vmem>>, vector<1x16x16xbf16>
    %81 = vector.shape_cast %80 : vector<1x16x16xbf16> to vector<16x16xbf16>
    %cst_46 = arith.constant dense<0.000000e+00> : vector<16x16xf32>
    %82 = tpu.matmul %74, %81, %cst_46 {dimension_numbers = #tpu.dot_dimension_numbers<[1], [0], [0], [1], [0, 0, 1, 1], [], []>} : vector<16x16xbf16>, vector<16x16xbf16>, vector<16x16xf32> -> vector<16x16xf32>
    %83 = arith.addf %79, %82 : vector<16x16xf32>
    %c2_47 = arith.constant 2 : index
    %c0_48 = arith.constant 0 : index
    %c0_49 = arith.constant 0 : index
    %84 = vector.load %arg9[%c2_47, %c0_48, %c0_49] : memref<3x16x16xbf16, #tpu.memory_space<vmem>>, vector<1x16x16xbf16>
    %85 = vector.shape_cast %84 : vector<1x16x16xbf16> to vector<16x16xbf16>
    %cst_50 = arith.constant dense<0.000000e+00> : vector<16x16xf32>
    %86 = tpu.matmul %76, %85, %cst_50 {dimension_numbers = #tpu.dot_dimension_numbers<[1], [0], [0], [1], [0, 0, 1, 1], [], []>} : vector<16x16xbf16>, vector<16x16xbf16>, vector<16x16xf32> -> vector<16x16xf32>
    %87 = arith.addf %83, %86 : vector<16x16xf32>
    %c0_51 = arith.constant 0 : index
    %c0_52 = arith.constant 0 : index
    %88 = vector.load %arg10[%c0_51, %c0_52] : memref<1x16xf32, #tpu.memory_space<vmem>>, vector<1x16xf32>
    %89 = vector.broadcast %88 : vector<1x16xf32> to vector<16x16xf32>
    %90 = arith.addf %87, %89 : vector<16x16xf32>
    %c0_53 = arith.constant 0 : index
    %c0_54 = arith.constant 0 : index
    %91 = vector.load %arg11[%c0_53, %c0_54] : memref<1x16xf32, #tpu.memory_space<vmem>>, vector<1x16xf32>
    %c0_55 = arith.constant 0 : index
    %c0_56 = arith.constant 0 : index
    %92 = vector.load %arg12[%c0_55, %c0_56] : memref<1x16xf32, #tpu.memory_space<vmem>>, vector<1x16xf32>
    %cst_57 = arith.constant dense<0.000000e+00> : vector<16xf32>
    %93 = vector.multi_reduction <add>, %90, %cst_57 [1] : vector<16x16xf32> to vector<16xf32>
    %94 = vector.shape_cast %93 : vector<16xf32> to vector<16x1xf32>
    %cst_58 = arith.constant 1.600000e+01 : f32
    %95 = vector.broadcast %cst_58 : f32 to vector<16x1xf32>
    %96 = arith.divf %94, %95 : vector<16x1xf32>
    %97 = vector.broadcast %96 : vector<16x1xf32> to vector<16x16xf32>
    %98 = arith.subf %90, %97 : vector<16x16xf32>
    %99 = arith.mulf %98, %98 : vector<16x16xf32>
    %cst_59 = arith.constant dense<0.000000e+00> : vector<16xf32>
    %100 = vector.multi_reduction <add>, %99, %cst_59 [1] : vector<16x16xf32> to vector<16xf32>
    %101 = vector.shape_cast %100 : vector<16xf32> to vector<16x1xf32>
    %cst_60 = arith.constant 1.600000e+01 : f32
    %102 = vector.broadcast %cst_60 : f32 to vector<16x1xf32>
    %103 = arith.divf %101, %102 : vector<16x1xf32>
    %104 = vector.broadcast %96 : vector<16x1xf32> to vector<16x16xf32>
    %105 = arith.subf %90, %104 : vector<16x16xf32>
    %cst_61 = arith.constant 9.99999974E-6 : f32
    %106 = vector.broadcast %cst_61 : f32 to vector<16x1xf32>
    %107 = arith.addf %103, %106 : vector<16x1xf32>
    %108 = math.rsqrt %107 : vector<16x1xf32>
    %109 = vector.broadcast %108 : vector<16x1xf32> to vector<16x16xf32>
    %110 = arith.mulf %105, %109 : vector<16x16xf32>
    %111 = vector.broadcast %91 : vector<1x16xf32> to vector<16x16xf32>
    %112 = arith.mulf %110, %111 : vector<16x16xf32>
    %113 = vector.broadcast %92 : vector<1x16xf32> to vector<16x16xf32>
    %114 = arith.addf %112, %113 : vector<16x16xf32>
    %cst_62 = arith.constant 0.000000e+00 : f32
    %115 = vector.broadcast %cst_62 : f32 to vector<16x16xf32>
    %116 = arith.maximumf %114, %115 : vector<16x16xf32>
    %117 = arith.truncf %116 : vector<16x16xf32> to vector<16x16xbf16>
    %c0_63 = arith.constant 0 : index
    %c0_64 = arith.constant 0 : index
    %118 = vector.load %arg13[%c0_63, %c0_64] : memref<16x32xbf16, #tpu.memory_space<vmem>>, vector<16x32xbf16>
    %cst_65 = arith.constant dense<0.000000e+00> : vector<16x32xf32>
    %119 = tpu.matmul %117, %118, %cst_65 {dimension_numbers = #tpu.dot_dimension_numbers<[1], [0], [0], [1], [0, 0, 1, 1], [], []>} : vector<16x16xbf16>, vector<16x32xbf16>, vector<16x32xf32> -> vector<16x32xf32>
    %c0_66 = arith.constant 0 : index
    %c0_67 = arith.constant 0 : index
    %120 = vector.load %arg14[%c0_66, %c0_67] : memref<1x32xf32, #tpu.memory_space<vmem>>, vector<1x32xf32>
    %121 = vector.broadcast %120 : vector<1x32xf32> to vector<16x32xf32>
    %122 = arith.addf %119, %121 : vector<16x32xf32>
    %123 = arith.addf %11, %122 : vector<16x32xf32>
    %c0_68 = arith.constant 0 : index
    %c0_69 = arith.constant 0 : index
    %124 = vector.load %arg15[%c0_68, %c0_69] : memref<1x32xf32, #tpu.memory_space<vmem>>, vector<1x32xf32>
    %c0_70 = arith.constant 0 : index
    %c0_71 = arith.constant 0 : index
    %125 = vector.load %arg16[%c0_70, %c0_71] : memref<1x32xf32, #tpu.memory_space<vmem>>, vector<1x32xf32>
    %cst_72 = arith.constant dense<0.000000e+00> : vector<16xf32>
    %126 = vector.multi_reduction <add>, %123, %cst_72 [1] : vector<16x32xf32> to vector<16xf32>
    %127 = vector.shape_cast %126 : vector<16xf32> to vector<16x1xf32>
    %cst_73 = arith.constant 3.200000e+01 : f32
    %128 = vector.broadcast %cst_73 : f32 to vector<16x1xf32>
    %129 = arith.divf %127, %128 : vector<16x1xf32>
    %130 = vector.broadcast %129 : vector<16x1xf32> to vector<16x32xf32>
    %131 = arith.subf %123, %130 : vector<16x32xf32>
    %132 = arith.mulf %131, %131 : vector<16x32xf32>
    %cst_74 = arith.constant dense<0.000000e+00> : vector<16xf32>
    %133 = vector.multi_reduction <add>, %132, %cst_74 [1] : vector<16x32xf32> to vector<16xf32>
    %134 = vector.shape_cast %133 : vector<16xf32> to vector<16x1xf32>
    %cst_75 = arith.constant 3.200000e+01 : f32
    %135 = vector.broadcast %cst_75 : f32 to vector<16x1xf32>
    %136 = arith.divf %134, %135 : vector<16x1xf32>
    %137 = vector.broadcast %129 : vector<16x1xf32> to vector<16x32xf32>
    %138 = arith.subf %123, %137 : vector<16x32xf32>
    %cst_76 = arith.constant 9.99999974E-6 : f32
    %139 = vector.broadcast %cst_76 : f32 to vector<16x1xf32>
    %140 = arith.addf %136, %139 : vector<16x1xf32>
    %141 = math.rsqrt %140 : vector<16x1xf32>
    %142 = vector.broadcast %141 : vector<16x1xf32> to vector<16x32xf32>
    %143 = arith.mulf %138, %142 : vector<16x32xf32>
    %144 = vector.broadcast %124 : vector<1x32xf32> to vector<16x32xf32>
    %145 = arith.mulf %143, %144 : vector<16x32xf32>
    %146 = vector.broadcast %125 : vector<1x32xf32> to vector<16x32xf32>
    %147 = arith.addf %145, %146 : vector<16x32xf32>
    %cst_77 = arith.constant 0.000000e+00 : f32
    %148 = vector.broadcast %cst_77 : f32 to vector<16x32xf32>
    %149 = arith.maximumf %147, %148 : vector<16x32xf32>
    %150 = arith.truncf %149 : vector<16x32xf32> to vector<16x32xbf16>
    %c0_78 = arith.constant 0 : index
    %c0_79 = arith.constant 0 : index
    %151 = vector.load %arg17[%c0_78, %c0_79] : memref<32x16xbf16, #tpu.memory_space<vmem>>, vector<32x16xbf16>
    %cst_80 = arith.constant dense<0.000000e+00> : vector<16x16xf32>
    %152 = tpu.matmul %150, %151, %cst_80 {dimension_numbers = #tpu.dot_dimension_numbers<[1], [0], [0], [1], [0, 0, 1, 1], [], []>} : vector<16x32xbf16>, vector<32x16xbf16>, vector<16x16xf32> -> vector<16x16xf32>
    %c0_81 = arith.constant 0 : index
    %c0_82 = arith.constant 0 : index
    %153 = vector.load %arg18[%c0_81, %c0_82] : memref<1x16xf32, #tpu.memory_space<vmem>>, vector<1x16xf32>
    %154 = vector.broadcast %153 : vector<1x16xf32> to vector<16x16xf32>
    %155 = arith.addf %152, %154 : vector<16x16xf32>
    %c0_83 = arith.constant 0 : index
    %c0_84 = arith.constant 0 : index
    %156 = vector.load %arg19[%c0_83, %c0_84] : memref<1x16xf32, #tpu.memory_space<vmem>>, vector<1x16xf32>
    %c0_85 = arith.constant 0 : index
    %c0_86 = arith.constant 0 : index
    %157 = vector.load %arg20[%c0_85, %c0_86] : memref<1x16xf32, #tpu.memory_space<vmem>>, vector<1x16xf32>
    %cst_87 = arith.constant dense<0.000000e+00> : vector<16xf32>
    %158 = vector.multi_reduction <add>, %155, %cst_87 [1] : vector<16x16xf32> to vector<16xf32>
    %159 = vector.shape_cast %158 : vector<16xf32> to vector<16x1xf32>
    %cst_88 = arith.constant 1.600000e+01 : f32
    %160 = vector.broadcast %cst_88 : f32 to vector<16x1xf32>
    %161 = arith.divf %159, %160 : vector<16x1xf32>
    %162 = vector.broadcast %161 : vector<16x1xf32> to vector<16x16xf32>
    %163 = arith.subf %155, %162 : vector<16x16xf32>
    %164 = arith.mulf %163, %163 : vector<16x16xf32>
    %cst_89 = arith.constant dense<0.000000e+00> : vector<16xf32>
    %165 = vector.multi_reduction <add>, %164, %cst_89 [1] : vector<16x16xf32> to vector<16xf32>
    %166 = vector.shape_cast %165 : vector<16xf32> to vector<16x1xf32>
    %cst_90 = arith.constant 1.600000e+01 : f32
    %167 = vector.broadcast %cst_90 : f32 to vector<16x1xf32>
    %168 = arith.divf %166, %167 : vector<16x1xf32>
    %169 = vector.broadcast %161 : vector<16x1xf32> to vector<16x16xf32>
    %170 = arith.subf %155, %169 : vector<16x16xf32>
    %cst_91 = arith.constant 9.99999974E-6 : f32
    %171 = vector.broadcast %cst_91 : f32 to vector<16x1xf32>
    %172 = arith.addf %168, %171 : vector<16x1xf32>
    %173 = math.rsqrt %172 : vector<16x1xf32>
    %174 = vector.broadcast %173 : vector<16x1xf32> to vector<16x16xf32>
    %175 = arith.mulf %170, %174 : vector<16x16xf32>
    %176 = vector.broadcast %156 : vector<1x16xf32> to vector<16x16xf32>
    %177 = arith.mulf %175, %176 : vector<16x16xf32>
    %178 = vector.broadcast %157 : vector<1x16xf32> to vector<16x16xf32>
    %179 = arith.addf %177, %178 : vector<16x16xf32>
    %cst_92 = arith.constant 0.000000e+00 : f32
    %180 = vector.broadcast %cst_92 : f32 to vector<16x16xf32>
    %181 = arith.maximumf %179, %180 : vector<16x16xf32>
    %c2_93 = arith.constant 2 : index
    %c0_94 = arith.constant 0 : index
    %182 = vector.load %arg28[%c2_93, %c0_94] : memref<20x16xf32, #tpu.memory_space<vmem>>, vector<16x16xf32>
    tpu.vector_store %arg28[%c2_93, %c0_94], %181 {strides = array<i32>} : memref<20x16xf32, #tpu.memory_space<vmem>>, vector<16x16xf32>,
    %c0_95 = arith.constant 0 : index
    %c0_96 = arith.constant 0 : index
    %183 = vector.load %arg28[%c0_95, %c0_96] : memref<20x16xf32, #tpu.memory_space<vmem>>, vector<16x16xf32>
    %184 = arith.truncf %183 : vector<16x16xf32> to vector<16x16xbf16>
    %c2_97 = arith.constant 2 : index
    %c0_98 = arith.constant 0 : index
    %185 = vector.load %arg28[%c2_97, %c0_98] : memref<20x16xf32, #tpu.memory_space<vmem>>, vector<16x16xf32>
    %186 = arith.truncf %185 : vector<16x16xf32> to vector<16x16xbf16>
    %c4 = arith.constant 4 : index
    %c0_99 = arith.constant 0 : index
    %187 = vector.load %arg28[%c4, %c0_99] : memref<20x16xf32, #tpu.memory_space<vmem>>, vector<16x16xf32>
    %188 = arith.truncf %187 : vector<16x16xf32> to vector<16x16xbf16>
    %c0_100 = arith.constant 0 : index
    %c0_101 = arith.constant 0 : index
    %c0_102 = arith.constant 0 : index
    %189 = vector.load %arg21[%c0_100, %c0_101, %c0_102] : memref<3x16x16xbf16, #tpu.memory_space<vmem>>, vector<1x16x16xbf16>
    %190 = vector.shape_cast %189 : vector<1x16x16xbf16> to vector<16x16xbf16>
    %cst_103 = arith.constant dense<0.000000e+00> : vector<16x16xf32>
    %191 = tpu.matmul %184, %190, %cst_103 {dimension_numbers = #tpu.dot_dimension_numbers<[1], [0], [0], [1], [0, 0, 1, 1], [], []>} : vector<16x16xbf16>, vector<16x16xbf16>, vector<16x16xf32> -> vector<16x16xf32>
    %c1_104 = arith.constant 1 : index
    %c0_105 = arith.constant 0 : index
    %c0_106 = arith.constant 0 : index
    %192 = vector.load %arg21[%c1_104, %c0_105, %c0_106] : memref<3x16x16xbf16, #tpu.memory_space<vmem>>, vector<1x16x16xbf16>
    %193 = vector.shape_cast %192 : vector<1x16x16xbf16> to vector<16x16xbf16>
    %cst_107 = arith.constant dense<0.000000e+00> : vector<16x16xf32>
    %194 = tpu.matmul %186, %193, %cst_107 {dimension_numbers = #tpu.dot_dimension_numbers<[1], [0], [0], [1], [0, 0, 1, 1], [], []>} : vector<16x16xbf16>, vector<16x16xbf16>, vector<16x16xf32> -> vector<16x16xf32>
    %195 = arith.addf %191, %194 : vector<16x16xf32>
    %c2_108 = arith.constant 2 : index
    %c0_109 = arith.constant 0 : index
    %c0_110 = arith.constant 0 : index
    %196 = vector.load %arg21[%c2_108, %c0_109, %c0_110] : memref<3x16x16xbf16, #tpu.memory_space<vmem>>, vector<1x16x16xbf16>
    %197 = vector.shape_cast %196 : vector<1x16x16xbf16> to vector<16x16xbf16>
    %cst_111 = arith.constant dense<0.000000e+00> : vector<16x16xf32>
    %198 = tpu.matmul %188, %197, %cst_111 {dimension_numbers = #tpu.dot_dimension_numbers<[1], [0], [0], [1], [0, 0, 1, 1], [], []>} : vector<16x16xbf16>, vector<16x16xbf16>, vector<16x16xf32> -> vector<16x16xf32>
    %199 = arith.addf %195, %198 : vector<16x16xf32>
    %c0_112 = arith.constant 0 : index
    %c0_113 = arith.constant 0 : index
    %200 = vector.load %arg22[%c0_112, %c0_113] : memref<1x16xf32, #tpu.memory_space<vmem>>, vector<1x16xf32>
    %201 = vector.broadcast %200 : vector<1x16xf32> to vector<16x16xf32>
    %202 = arith.addf %199, %201 : vector<16x16xf32>
    %c0_114 = arith.constant 0 : index
    %c0_115 = arith.constant 0 : index
    %203 = vector.load %arg23[%c0_114, %c0_115] : memref<1x16xf32, #tpu.memory_space<vmem>>, vector<1x16xf32>
    %c0_116 = arith.constant 0 : index
    %c0_117 = arith.constant 0 : index
    %204 = vector.load %arg24[%c0_116, %c0_117] : memref<1x16xf32, #tpu.memory_space<vmem>>, vector<1x16xf32>
    %cst_118 = arith.constant dense<0.000000e+00> : vector<16xf32>
    %205 = vector.multi_reduction <add>, %202, %cst_118 [1] : vector<16x16xf32> to vector<16xf32>
    %206 = vector.shape_cast %205 : vector<16xf32> to vector<16x1xf32>
    %cst_119 = arith.constant 1.600000e+01 : f32
    %207 = vector.broadcast %cst_119 : f32 to vector<16x1xf32>
    %208 = arith.divf %206, %207 : vector<16x1xf32>
    %209 = vector.broadcast %208 : vector<16x1xf32> to vector<16x16xf32>
    %210 = arith.subf %202, %209 : vector<16x16xf32>
    %211 = arith.mulf %210, %210 : vector<16x16xf32>
    %cst_120 = arith.constant dense<0.000000e+00> : vector<16xf32>
    %212 = vector.multi_reduction <add>, %211, %cst_120 [1] : vector<16x16xf32> to vector<16xf32>
    %213 = vector.shape_cast %212 : vector<16xf32> to vector<16x1xf32>
    %cst_121 = arith.constant 1.600000e+01 : f32
    %214 = vector.broadcast %cst_121 : f32 to vector<16x1xf32>
    %215 = arith.divf %213, %214 : vector<16x1xf32>
    %216 = vector.broadcast %208 : vector<16x1xf32> to vector<16x16xf32>
    %217 = arith.subf %202, %216 : vector<16x16xf32>
    %cst_122 = arith.constant 9.99999974E-6 : f32
    %218 = vector.broadcast %cst_122 : f32 to vector<16x1xf32>
    %219 = arith.addf %215, %218 : vector<16x1xf32>
    %220 = math.rsqrt %219 : vector<16x1xf32>
    %221 = vector.broadcast %220 : vector<16x1xf32> to vector<16x16xf32>
    %222 = arith.mulf %217, %221 : vector<16x16xf32>
    %223 = vector.broadcast %203 : vector<1x16xf32> to vector<16x16xf32>
    %224 = arith.mulf %222, %223 : vector<16x16xf32>
    %225 = vector.broadcast %204 : vector<1x16xf32> to vector<16x16xf32>
    %226 = arith.addf %224, %225 : vector<16x16xf32>
    %cst_123 = arith.constant 0.000000e+00 : f32
    %227 = vector.broadcast %cst_123 : f32 to vector<16x16xf32>
    %228 = arith.maximumf %226, %227 : vector<16x16xf32>
    %229 = arith.truncf %228 : vector<16x16xf32> to vector<16x16xbf16>
    %c0_124 = arith.constant 0 : index
    %c0_125 = arith.constant 0 : index
    %230 = vector.load %arg25[%c0_124, %c0_125] : memref<16x32xbf16, #tpu.memory_space<vmem>>, vector<16x32xbf16>
    %cst_126 = arith.constant dense<0.000000e+00> : vector<16x32xf32>
    %231 = tpu.matmul %229, %230, %cst_126 {dimension_numbers = #tpu.dot_dimension_numbers<[1], [0], [0], [1], [0, 0, 1, 1], [], []>} : vector<16x16xbf16>, vector<16x32xbf16>, vector<16x32xf32> -> vector<16x32xf32>
    %c0_127 = arith.constant 0 : index
    %c0_128 = arith.constant 0 : index
    %232 = vector.load %arg26[%c0_127, %c0_128] : memref<1x32xf32, #tpu.memory_space<vmem>>, vector<1x32xf32>
    %233 = vector.broadcast %232 : vector<1x32xf32> to vector<16x32xf32>
    %234 = arith.addf %231, %233 : vector<16x32xf32>
    %235 = arith.addf %123, %234 : vector<16x32xf32>
    %c0_129 = arith.constant 0 : index
    %c0_130 = arith.constant 0 : index
    %c0_131 = arith.constant 0 : index
    %236 = vector.load %arg27[%c0_129, %c0_130, %c0_131] : memref<1x16x32xf32, #tpu.memory_space<vmem>>, vector<1x16x32xf32>
    %237 = vector.shape_cast %236 : vector<1x16x32xf32> to vector<16x32xf32>
    %238 = vector.shape_cast %235 : vector<16x32xf32> to vector<1x16x32xf32>
    tpu.vector_store %arg27[%c0_129, %c0_130, %c0_131], %238 {strides = array<i32>} : memref<1x16x32xf32, #tpu.memory_space<vmem>>, vector<1x16x32xf32>,
    return
  }
  func.func @transform_0(%arg0: i32) -> (i32, i32, i32) {
    %c0_i32 = arith.constant 0 : i32
    %c0_i32_0 = arith.constant 0 : i32
    %c0_i32_1 = arith.constant 0 : i32
    return %arg0, %c0_i32, %c0_i32_0 : i32, i32, i32
  }
  func.func @transform_1(%arg0: i32) -> (i32, i32) {
    %c0_i32 = arith.constant 0 : i32
    %c0_i32_0 = arith.constant 0 : i32
    %c0_i32_1 = arith.constant 0 : i32
    return %c0_i32, %c0_i32_0 : i32, i32
  }
  func.func @transform_2(%arg0: i32) -> (i32, i32) {
    %c0_i32 = arith.constant 0 : i32
    %c0_i32_0 = arith.constant 0 : i32
    %c0_i32_1 = arith.constant 0 : i32
    return %c0_i32, %c0_i32_0 : i32, i32
  }
  func.func @transform_3(%arg0: i32) -> (i32, i32) {
    %c0_i32 = arith.constant 0 : i32
    %c0_i32_0 = arith.constant 0 : i32
    %c0_i32_1 = arith.constant 0 : i32
    return %c0_i32, %c0_i32_0 : i32, i32
  }
  func.func @transform_4(%arg0: i32) -> (i32, i32) {
    %c0_i32 = arith.constant 0 : i32
    %c0_i32_0 = arith.constant 0 : i32
    %c0_i32_1 = arith.constant 0 : i32
    return %c0_i32, %c0_i32_0 : i32, i32
  }
  func.func @transform_5(%arg0: i32) -> (i32, i32) {
    %c0_i32 = arith.constant 0 : i32
    %c0_i32_0 = arith.constant 0 : i32
    %c0_i32_1 = arith.constant 0 : i32
    return %c0_i32, %c0_i32_0 : i32, i32
  }
  func.func @transform_6(%arg0: i32) -> (i32, i32) {
    %c0_i32 = arith.constant 0 : i32
    %c0_i32_0 = arith.constant 0 : i32
    %c0_i32_1 = arith.constant 0 : i32
    return %c0_i32, %c0_i32_0 : i32, i32
  }
  func.func @transform_7(%arg0: i32) -> (i32, i32) {
    %c0_i32 = arith.constant 0 : i32
    %c0_i32_0 = arith.constant 0 : i32
    %c0_i32_1 = arith.constant 0 : i32
    return %c0_i32, %c0_i32_0 : i32, i32
  }
  func.func @transform_8(%arg0: i32) -> (i32, i32, i32) {
    %c0_i32 = arith.constant 0 : i32
    %c0_i32_0 = arith.constant 0 : i32
    %c0_i32_1 = arith.constant 0 : i32
    %c0_i32_2 = arith.constant 0 : i32
    return %c0_i32, %c0_i32_0, %c0_i32_1 : i32, i32, i32
  }
  func.func @transform_9(%arg0: i32) -> (i32, i32) {
    %c0_i32 = arith.constant 0 : i32
    %c0_i32_0 = arith.constant 0 : i32
    %c0_i32_1 = arith.constant 0 : i32
    return %c0_i32, %c0_i32_0 : i32, i32
  }
  func.func @transform_10(%arg0: i32) -> (i32, i32) {
    %c0_i32 = arith.constant 0 : i32
    %c0_i32_0 = arith.constant 0 : i32
    %c0_i32_1 = arith.constant 0 : i32
    return %c0_i32, %c0_i32_0 : i32, i32
  }
  func.func @transform_11(%arg0: i32) -> (i32, i32) {
    %c0_i32 = arith.constant 0 : i32
    %c0_i32_0 = arith.constant 0 : i32
    %c0_i32_1 = arith.constant 0 : i32
    return %c0_i32, %c0_i32_0 : i32, i32
  }
  func.func @transform_12(%arg0: i32) -> (i32, i32) {
    %c0_i32 = arith.constant 0 : i32
    %c0_i32_0 = arith.constant 0 : i32
    %c0_i32_1 = arith.constant 0 : i32
    return %c0_i32, %c0_i32_0 : i32, i32
  }
  func.func @transform_13(%arg0: i32) -> (i32, i32) {
    %c0_i32 = arith.constant 0 : i32
    %c0_i32_0 = arith.constant 0 : i32
    %c0_i32_1 = arith.constant 0 : i32
    return %c0_i32, %c0_i32_0 : i32, i32
  }
  func.func @transform_14(%arg0: i32) -> (i32, i32) {
    %c0_i32 = arith.constant 0 : i32
    %c0_i32_0 = arith.constant 0 : i32
    %c0_i32_1 = arith.constant 0 : i32
    return %c0_i32, %c0_i32_0 : i32, i32
  }
  func.func @transform_15(%arg0: i32) -> (i32, i32) {
    %c0_i32 = arith.constant 0 : i32
    %c0_i32_0 = arith.constant 0 : i32
    %c0_i32_1 = arith.constant 0 : i32
    return %c0_i32, %c0_i32_0 : i32, i32
  }
  func.func @transform_16(%arg0: i32) -> (i32, i32) {
    %c0_i32 = arith.constant 0 : i32
    %c0_i32_0 = arith.constant 0 : i32
    %c0_i32_1 = arith.constant 0 : i32
    return %c0_i32, %c0_i32_0 : i32, i32
  }
  func.func @transform_17(%arg0: i32) -> (i32, i32) {
    %c0_i32 = arith.constant 0 : i32
    %c0_i32_0 = arith.constant 0 : i32
    %c0_i32_1 = arith.constant 0 : i32
    return %c0_i32, %c0_i32_0 : i32, i32
  }
  func.func @transform_18(%arg0: i32) -> (i32, i32) {
    %c0_i32 = arith.constant 0 : i32
    %c0_i32_0 = arith.constant 0 : i32
    %c0_i32_1 = arith.constant 0 : i32
    return %c0_i32, %c0_i32_0 : i32, i32
  }
  func.func @transform_19(%arg0: i32) -> (i32, i32) {
    %c0_i32 = arith.constant 0 : i32
    %c0_i32_0 = arith.constant 0 : i32
    %c0_i32_1 = arith.constant 0 : i32
    return %c0_i32, %c0_i32_0 : i32, i32
  }
  func.func @transform_20(%arg0: i32) -> (i32, i32, i32) {
    %c0_i32 = arith.constant 0 : i32
    %c0_i32_0 = arith.constant 0 : i32
    %c0_i32_1 = arith.constant 0 : i32
    %c0_i32_2 = arith.constant 0 : i32
    return %c0_i32, %c0_i32_0, %c0_i32_1 : i32, i32, i32
  }
  func.func @transform_21(%arg0: i32) -> (i32, i32) {
    %c0_i32 = arith.constant 0 : i32
    %c0_i32_0 = arith.constant 0 : i32
    %c0_i32_1 = arith.constant 0 : i32
    return %c0_i32, %c0_i32_0 : i32, i32
  }
  func.func @transform_22(%arg0: i32) -> (i32, i32) {
    %c0_i32 = arith.constant 0 : i32
    %c0_i32_0 = arith.constant 0 : i32
    %c0_i32_1 = arith.constant 0 : i32
    return %c0_i32, %c0_i32_0 : i32, i32
  }
  func.func @transform_23(%arg0: i32) -> (i32, i32) {
    %c0_i32 = arith.constant 0 : i32
    %c0_i32_0 = arith.constant 0 : i32
    %c0_i32_1 = arith.constant 0 : i32
    return %c0_i32, %c0_i32_0 : i32, i32
  }
  func.func @transform_24(%arg0: i32) -> (i32, i32) {
    %c0_i32 = arith.constant 0 : i32
    %c0_i32_0 = arith.constant 0 : i32
    %c0_i32_1 = arith.constant 0 : i32
    return %c0_i32, %c0_i32_0 : i32, i32
  }
  func.func @transform_25(%arg0: i32) -> (i32, i32) {
    %c0_i32 = arith.constant 0 : i32
    %c0_i32_0 = arith.constant 0 : i32
    %c0_i32_1 = arith.constant 0 : i32
    return %c0_i32, %c0_i32_0 : i32, i32
  }
  func.func @transform_26(%arg0: i32) -> (i32, i32, i32) {
    %c0_i32 = arith.constant 0 : i32
    %c0_i32_0 = arith.constant 0 : i32
    %c0_i32_1 = arith.constant 0 : i32
    return %arg0, %c0_i32, %c0_i32_0 : i32, i32, i32
  }
}

</mosaic_0001>

<bundles_post_ra>
// kernel: tpu_custom_call.1
= control target key start
LH: loop header
LB: loop body
LE: loop exit
PB: predicated region body
PF: predicated region fallthrough
CT: control target
= control target key end

     0   :  { %s3010_s0 = inlined_call_operand.vmem [shape: s32[2,16,1], index: 0, kind: input, shape index: {}]   ;;  %s3011_s1 = inlined_call_operand.vmem [shape: f32[20,32], index: 1, kind: input, shape index: {}]   ;;  %s3012_s2 = inlined_call_operand.hbm [shape: f32[1,32], index: 2, kind: input, shape index: {}]   ;;  %s3013_s3 = inlined_call_operand.hbm [shape: f32[1,32], index: 3, kind: input, shape index: {}]   ;;  %s3014_s4 = inlined_call_operand.vmem [shape: bf16[32,16], index: 4, kind: input, shape index: {}]   ;;  %s3015_s5 = inlined_call_operand.hbm [shape: f32[1,16], index: 5, kind: input, shape index: {}]   ;;  %s3016_s6 = inlined_call_operand.hbm [shape: f32[1,16], index: 6, kind: input, shape index: {}]   ;;  %s3017_s7 = inlined_call_operand.vmem [shape: f32[1,16], index: 7, kind: input, shape index: {}]   ;;  %s3018_s8 = inlined_call_operand.vmem [shape: bf16[3,16,16], index: 8, kind: input, shape index: {}]   ;;  %s3019_s9 = inlined_call_operand.vmem [shape: f32[1,16], index: 9, kind: input, shape index: {}]   ;;  %s3020_s10 = inlined_call_operand.vmem [shape: f32[1,16], index: 10, kind: input, shape index: {}]   ;;  %s3021_s11 = inlined_call_operand.vmem [shape: f32[1,16], index: 11, kind: input, shape index: {}]   ;;  %s3022_s12 = inlined_call_operand.vmem [shape: bf16[16,32], index: 12, kind: input, shape index: {}]   ;;  %s3023_s13 = inlined_call_operand.vmem [shape: f32[1,32], index: 13, kind: input, shape index: {}]   ;;  %s3024_s14 = inlined_call_operand.vmem [shape: f32[1,32], index: 14, kind: input, shape index: {}]   ;;  %s3025_s15 = inlined_call_operand.vmem [shape: f32[1,32], index: 15, kind: input, shape index: {}]   ;;  %s3026_s16 = inlined_call_operand.vmem [shape: bf16[32,16], index: 16, kind: input, shape index: {}]   ;;  %s3027_s17 = inlined_call_operand.vmem [shape: f32[1,16], index: 17, kind: input, shape index: {}]   ;;  %s3028_s18 = inlined_call_operand.vmem [shape: f32[1,16], index: 18, kind: input, shape index: {}]   ;;  %s3029_s19 = inlined_call_operand.vmem [shape: f32[1,16], index: 19, kind: input, shape index: {}]   ;;  %s3030_s20 = inlined_call_operand.vmem [shape: bf16[3,16,16], index: 20, kind: input, shape index: {}]   ;;  %s3031_s21 = inlined_call_operand.vmem [shape: f32[1,16], index: 21, kind: input, shape index: {}]   ;;  %s3032_s22 = inlined_call_operand.vmem [shape: f32[1,16], index: 22, kind: input, shape index: {}]   ;;  %s3033_s23 = inlined_call_operand.vmem [shape: f32[1,16], index: 23, kind: input, shape index: {}]   ;;  %s3034_s24 = inlined_call_operand.vmem [shape: bf16[16,32], index: 24, kind: input, shape index: {}]   ;;  %s3035_s25 = inlined_call_operand.vmem [shape: f32[1,32], index: 25, kind: input, shape index: {}]   ;;  %s3036_s26 = inlined_call_operand.hbm [shape: f32[2,16,32], index: 26, kind: output, shape index: {}]  }
   0x1   :  { %3059 = sst [smem:[#allocation23_spill]] %s3010_s0 }
   0x2   :  { %3060 = sst [smem:[#allocation24_spill]] %s3011_s1 }
   0x3   :  { %3061 = sst [smem:[#allocation25_spill]] %s3012_s2 }
   0x4   :  { %3062 = sst [smem:[#allocation26_spill]] %s3013_s3 }
   0x5   :  { %3063 = sst [smem:[#allocation27_spill]] %s3014_s4 }
   0x6   :  { %3064 = sst [smem:[#allocation28_spill]] %s3015_s5 }
   0x7   :  { %3065 = sst [smem:[#allocation29_spill]] %s3016_s6 }
   0x8   :  { %3066 = sst [smem:[#allocation30_spill]] %s3017_s7 }
   0x9   :  { %3067 = sst [smem:[#allocation31_spill]] %s3018_s8 }
   0xa   :  { %3068 = sst [smem:[#allocation32_spill]] %s3019_s9 }
   0xb   :  { %3069 = sst [smem:[#allocation33_spill]] %s3020_s10 }
   0xc   :  { %3070 = sst [smem:[#allocation34_spill]] %s3032_s22 }
   0xd   :  { %3071 = sst [smem:[#allocation35_spill]] %s3033_s23 }
   0xe   :  { %3072 = sst [smem:[#allocation36_spill]] %s3035_s25 }
   0xf   :  { %3073 = sst [smem:[#allocation37_spill]] %s3036_s26 }
  0x10   :  { %31 = vsyncpa [#allocation4], 0 }
  0x11   :  { %32 = vsyncpa [#allocation7], 0 }
  0x12   :  { %33 = vsyncpa [#allocation10], 0 }
  0x13   :  { %34 = vsyncpa [#allocation5], 0 }
  0x14   :  { %36 = vsyncpa [#allocation5 + $0x1], 0  ;;  %s2600_s27 = smov 0   ;;  %s2602_s3 = smov 0  }
  0x15   :  { %s2604_s7 = smov 0   ;;  %s2606_s28 = smov 0  }
  0x16 LB: > { %3074 = sst [smem:[#allocation16_spill]] %s2441_s27  ;;  %s2621_s8 = sadd.s32 4294967295, %s2453_s28   ;;  %s2453_s28 = sphi %s2606_s28, %s3116_s28   ;;  %s2449_s7 = sphi %s2604_s7, %s3118_s7   ;;  %s2445_s3 = sphi %s2602_s3, %s3120_s3   ;;  %s2441_s27 = sphi %s2600_s27, %s3119_s27  }
  0x17   : > { %3075 = sst [smem:[#allocation17_spill]] %s2449_s7  ;;  %s1968_s4 = sadd.s32 4294967294, %s2453_s28  }
  0x18   : > { %3076 = sst [smem:[#allocation18_spill]] %s2453_s28  ;;  %s2625_s29 = sadd.s32 1, %s2453_s28  }
  0x19   : > { %3077 = sst [smem:[#allocation19_spill]] %s2625_s29  ;;  %s600_s0 = sadd.s32 1, %s2449_s7 }
  0x1a   : > { %s597_s9 = ssub.s32 %s2453_s28, %s2625_s29  ;;  %p610_p0 = scmp.ne.s32.totalorder %s2449_s7, %s2445_s3 }
  0x1b   : > { %p598_p1 = scmp.eq.s32.totalorder %s597_s9, 0  ;;  %p611_p2 = scmp.eq.s32.totalorder %s2621_s8, 1 }
  0x1c   : > { %p616_p3 = scmp.ne.s32.totalorder %s2445_s3, %s2441_s27  ;;  %p617_p4 = scmp.eq.s32.totalorder %s1968_s4, 1 }
  0x1d   : > { %s2636_s30 = scalar_select %p598_p1, %s2449_s7, %s600_s0  }
  0x1e   : > { %p2638_p5 = por %p611_p2, %p610_p0  ;;  %p2642_p6 = por %p617_p4, %p616_p3 }
  0x1f   : > { %3078 = sst [smem:[#allocation20_spill]] %s2636_s30  ;;  %p1969_p7 = scmp.ge.s32.totalorder %s2453_s28, 1 }
  0x20   : > { %s3079_s2 = scalar_select %p2638_p5, 1, 0 }
  0x21   : > { %s3081_s5 = scalar_select %p2642_p6, 1, 0 }
  0x22   : > { %3080 = sst [smem:[#allocation21_spill]] %s3079_s2  ;;  %p624_p8 = scmp.lt.s32.totalorder %s2453_s28, 3 }
  0x23   : > { %3082 = sst [smem:[#allocation22_spill]] %s3081_s5  ;;  %p3053_p9 = scmp.eq.s32.totalorder %s2621_s8, 0 }
  0x24   : > { %p2649_p10 = pnand %p1969_p7, %p624_p8  ;;  %s2455_s6 = smov [#allocation6]  }
  0x25   : > { %s651_s1 = sshll.u32 %s2455_s6, 4  ;;  %s2456_s4 = smov [#allocation3]   ;;  %s652_s1 = int_to_ptr.vmem [resolvable:$true] %s651_s1 }
  0x26   : > { %s3083_s10 = scalar_select %p2649_p10, 1, 0 }
  0x27   : > { %p2163_p11 = pneg %p2649_p10  ;;  %s640_s0 = sshll.u32 %s2456_s4, 4  ;;  %s2661_s0 = int_to_ptr.vmem [resolvable:$true] %s640_s0 }
  0x28   : > { %s2457_s30 = smov [#allocation8]   ;;  %s3085_s6 = sld [smem:[#allocation26_spill]] }
  0x29   : > { %p2657_p12 = pnand %p3053_p9, %p2163_p11  ;;  %s665_s7 = sshll.u32 %s2457_s30, 4  ;;  %s2663_s7 = int_to_ptr.vmem [resolvable:$true] %s665_s7 }
  0x2b   : > { %p2673_p0 = pneg %p2657_p12 }
  0x2e   : > { %s2267_s27 = scalar_lea.hbm %s3085_s6, 16 }
  0x2f   : > { %p2268_p13 = scmp.ne.s32.totalorder %s3085_s6, %s2267_s27  ;;  %p2274_p3 = scmp.lt.u32.totalorder %s2267_s27, %s3085_s6 }
  0x31   : > { %p2270_p1 = pnand %p2673_p0, %p2268_p13 }
  0x33   : > { %p2271_p2 = pneg %p2270_p1 }
  0x35   : > { %p2276_p4 = pnand %p2274_p3, %p2271_p2 }
  0x37   : > { %2279 = shalt.err (!%p2276_p4)
}
  0x38   : > { %s2280_s29 = scalar_lea.vmem %s652_s1, 16  ;;  %s2287_s26 = scalar_lea.vmem %s652_s1, 32 }
  0x39   : > { %p2281_p7 = scmp.ne.s32.totalorder %s652_s1, %s2280_s29  ;;  %p2288_p9 = scmp.lt.s32.totalorder %s652_s1, %s652_s1 }
  0x3a   : > { %p2289_p6 = scmp.lt.s32.totalorder %s2287_s26, %s2280_s29 }
  0x3b   : > { %p2283_p8 = pnand %p2281_p7, %p2673_p0 }
  0x3c   : > { %p2290_p5 = por %p2289_p6, %p2288_p9 }
  0x3d   : > { %p2284_p11 = pneg %p2283_p8 }
  0x3f   : > { %p2291_p10 = pnand %p2290_p5, %p2284_p11 }
  0x41   : > { %2294 = shalt.err (!%p2291_p10)
}
  0x42   : > { %2169 = dma.hbm_to_vmem [thread:$0]  (!%p2657_p12), %s3085_s6, 16, %s652_s1, [#allocation7]  }
  0x43   : > { %s3087_s30 = sld [smem:[#allocation25_spill]] }
  0x49   : > { %s2295_s25 = scalar_lea.hbm %s3087_s30, 16 }
  0x4a   : > { %p2296_p13 = scmp.ne.s32.totalorder %s3087_s30, %s2295_s25  ;;  %p2302_p5 = scmp.lt.u32.totalorder %s2295_s25, %s3087_s30 }
  0x4c   : > { %p2298_p1 = pnand %p2296_p13, %p2673_p0 }
  0x4e   : > { %p2299_p6 = pneg %p2298_p1 }
  0x50   : > { %p2304_p9 = pnand %p2302_p5, %p2299_p6 }
  0x52   : > { %2307 = shalt.err (!%p2304_p9)
}
  0x53   : > { %s2308_s1 = scalar_lea.vmem %s2661_s0, 16  ;;  %s2315_s22 = scalar_lea.vmem %s2661_s0, 32 }
  0x54   : > { %p2309_p10 = scmp.ne.s32.totalorder %s2661_s0, %s2308_s1  ;;  %p2316_p4 = scmp.lt.s32.totalorder %s2661_s0, %s2661_s0 }
  0x55   : > { %p2317_p7 = scmp.lt.s32.totalorder %s2315_s22, %s2308_s1 }
  0x56   : > { %p2311_p2 = pnand %p2309_p10, %p2673_p0 }
  0x57   : > { %p2318_p8 = por %p2317_p7, %p2316_p4 }
  0x58   : > { %p2312_p3 = pneg %p2311_p2 }
  0x5a   : > { %p2319_p11 = pnand %p2318_p8, %p2312_p3 }
  0x5c   : > { %2322 = shalt.err (!%p2319_p11)
}
  0x5d   : > { %2166 = dma.hbm_to_vmem [thread:$0]  (!%p2657_p12), %s3087_s30, 16, %s2661_s0, [#allocation4]  }
  0x5e   : > { %s3088_s27 = sld [smem:[#allocation28_spill]] }
  0x64   : > { %s3089_s2 = smov %s3088_s27  ;;  %s2323_s29 = scalar_lea.hbm %s3088_s27, 16 }
  0x65   : > { %p2324_p13 = scmp.ne.s32.totalorder %s3089_s2, %s2323_s29  ;;  %p2330_p5 = scmp.lt.u32.totalorder %s2323_s29, %s3089_s2 }
  0x67   : > { %p2326_p1 = pnand %p2324_p13, %p2673_p0 }
  0x69   : > { %p2327_p6 = pneg %p2326_p1 }
  0x6b   : > { %p2332_p9 = pnand %p2330_p5, %p2327_p6 }
  0x6d   : > { %2335 = shalt.err (!%p2332_p9)
}
  0x6e   : > { %s2336_s0 = scalar_lea.vmem %s2663_s7, 16  ;;  %s2343_s6 = scalar_lea.vmem %s2663_s7, 32 }
  0x6f   : > { %p2337_p10 = scmp.ne.s32.totalorder %s2663_s7, %s2336_s0  ;;  %p2344_p4 = scmp.lt.s32.totalorder %s2663_s7, %s2663_s7 }
  0x70   : > { %p2345_p7 = scmp.lt.s32.totalorder %s2343_s6, %s2336_s0 }
  0x71   : > { %p2339_p2 = pnand %p2337_p10, %p2673_p0 }
  0x72   : > { %p2346_p8 = por %p2345_p7, %p2344_p4 }
  0x73   : > { %p2340_p3 = pneg %p2339_p2 }
  0x75   : > { %p2347_p11 = pnand %p2346_p8, %p2340_p3 }
  0x77   : > { %2350 = shalt.err (!%p2347_p11)
}
  0x78   : > { %2172 = dma.hbm_to_vmem [thread:$0]  (!%p2657_p12), %s3089_s2, 16, %s2663_s7, [#allocation7]  }
  0x79   : > { %s2458_s28 = smov [#allocation9]   ;;  %s3090_s26 = sld [smem:[#allocation29_spill]] }
  0x7a   : > { %s676_s5 = sshll.u32 %s2458_s28, 4  ;;  %s677_s5 = int_to_ptr.vmem [resolvable:$true] %s676_s5 }
  0x7f   : > { %s2351_s1 = scalar_lea.hbm %s3090_s26, 16 }
  0x80   : > { %p2352_p13 = scmp.ne.s32.totalorder %s3090_s26, %s2351_s1  ;;  %p2358_p5 = scmp.lt.u32.totalorder %s2351_s1, %s3090_s26 }
  0x82   : > { %p2354_p1 = pnand %p2352_p13, %p2673_p0 }
  0x84   : > { %p2355_p6 = pneg %p2354_p1 }
  0x86   : > { %p2360_p9 = pnand %p2358_p5, %p2355_p6 }
  0x88   : > { %2363 = shalt.err (!%p2360_p9)
}
  0x89   : > { %s2364_s7 = scalar_lea.vmem %s677_s5, 16  ;;  %s2371_s23 = scalar_lea.vmem %s677_s5, 32 }
  0x8a   : > { %p2365_p10 = scmp.ne.s32.totalorder %s677_s5, %s2364_s7  ;;  %p2372_p4 = scmp.lt.s32.totalorder %s677_s5, %s677_s5 }
  0x8b   : > { %p2373_p7 = scmp.lt.s32.totalorder %s2371_s23, %s2364_s7 }
  0x8c   : > { %p2367_p2 = pnand %p2365_p10, %p2673_p0 }
  0x8d   : > { %p2374_p8 = por %p2373_p7, %p2372_p4 }
  0x8e   : > { %p2368_p3 = pneg %p2367_p2 }
  0x90   : > { %p2375_p11 = pnand %p2374_p8, %p2368_p3 }
  0x92   : > { %2378 = shalt.err (!%p2375_p11)
}
  0x93   : > { %2175 = dma.hbm_to_vmem [thread:$0]  (!%p2657_p12), %s3090_s26, 16, %s677_s5, [#allocation10]  }
  0x94   : > { %p3091_p13 = scmp.ne.s32.totalorder %s3083_s10, 0 }
  0x95   : > { %p3092_p1 = scmp.eq.s32.totalorder (!%p3091_p13), %s2621_s8, 0 }
  0x96   : > { %754 = sbr.rel (%p3091_p13) target bundleno = 3781 (0xec5), region = 124 }
  0x9d   : > { %2424 = dma.done.wait (%p3092_p1), [#allocation4], 16   ;;  %p3093_p0 = pmov %p3092_p1 }
  0x9f   : > { %2426 = vsyncadd (%p3093_p0), [#allocation4], 4294967280  ;;  %p3094_p6 = pmov %p3093_p0 }
  0xa0   : > { %p3095_p5 = pmov %p3093_p0 }
  0xa1   : > { %2428 = dma.done.wait (%p3094_p6), [#allocation7], 32  }
  0xa2   : > { %2430 = vsyncadd (%p3095_p5), [#allocation7], 4294967264  ;;  %p3096_p9 = pmov %p3093_p0 }
  0xa3   : > { %p3097_p12 = pmov %p3093_p0 }
  0xa4   : > { %2432 = dma.done.wait (%p3096_p9), [#allocation10], 16  }
  0xa5   : > { %2434 = vsyncadd (%p3097_p12), [#allocation10], 4294967280  ;;  %p836_p10 = scmp.lt.s32.totalorder %s2621_s8, 1  ;;  %v2459_v0 = vmov 0   ;;  %s3098_s5 = sld [smem:[#allocation23_spill]]  ;;  %v2460_v6 = vmov 0.0   ;;  %v849_v8 = vlaneseq }
  0xa6   : > { %2230 = vset.pattern.permute.xlu0 %v2459_v0  ;;  %s3099_s22 = sld [smem:[#allocation24_spill]]  ;;  %2077 = vmatprep.subr.bf16.mxu1 %v2460_v6  ;;  %vm871_vm0 = vcmask 1043456   ;;  %vm864_vm1 = vcmask 162816   ;;  %vm952_vm4 = vcmask 261120   ;;  %vm2461_vm5 = vmmov 0   ;;  %s3103_s23 = sld [smem:[#allocation30_spill]] }
  0xa7   : > { %s837_s10 = scalar_select %p836_p10, %s2621_s8, 1  ;;  %v850_v9 = vand.u32 127, %v849_v8  ;;  %2081 = vmatprep.mubr.msk.bf16.mxu1 %vm2461_vm5, %v2460_v6  ;;  %v1986_v37 = vld [vmem:[#allocation3] ss:$0 sm:$0xff]  ;;  %v1987_v41 = vld [vmem:[#allocation6] ss:$0 sm:$0xff] }
  0xa8   : > { %vm842_vm6 = vcmask 130048   ;;  %v1988_v49 = vld [vmem:[#allocation8] ss:$0 sm:$0xff]  ;;  %vm845_vm7 = vcmask 125952   ;;  %s3104_s30 = sld [smem:[#allocation32_spill]]  ;;  %s3105_s6 = sld [smem:[#allocation33_spill]] }
  0xa9   : > { %s2039_s9 = sshll.u32 %s837_s10, 4  ;;  %s3100_s10 = sld [smem:[#allocation27_spill]]  ;;  %843 = vst.msk [vmem:[#allocation2] sm:$0xff] %vm842_vm6, %v2460_v6  ;;  %844 = vst.msk [vmem:[#allocation2 + $0x8] sm:$0xff] %vm842_vm6, %v2460_v6 }
  0xaa   : > { %846 = vst.msk [vmem:[#allocation2 + $0x10] sm:$0xf] %vm845_vm7, %v2460_v6  ;;  %s3107_s1 = sld [smem:[#allocation35_spill]]  ;;  %s833_s0 = sand.u32 1, %s2445_s3  }
  0xab   : > { %s840_s27 = scalar_lea.vmem %s3098_s5, %s2039_s9  ;;  %s3108_s25 = sld [smem:[#allocation36_spill]] }
  0xac   : > { %v847_v1 = vld [vmem:[%s840_s27] sm:$0xff]  ;;  %v862_v3 = vld [vmem:[%s3099_s22 + $0x8] sm:$0xff]  ;;  %v863_v7 = vld [vmem:[%s3099_s22 + $0x10] sm:$0xf]  ;;  %s3109_s28 = sld [smem:[#allocation21_spill]]  ;;  %s2040_s9 = sshll.u32 %s2621_s8, 8 }
  0xad   : > { %v861_v2 = vld [vmem:[%s3099_s22] sm:$0xff]  ;;  %852 = vperm.xlu0 %2230, %v847_v1   ;;  %v848_v4 = vld [vmem:[%s840_s27 + $0x8] sm:$0xff]  ;;  %s3101_s27 = sld [smem:[#allocation31_spill]]  ;;  %s2969_s8 = scalar_lea.sflag [#allocation5], %s833_s0 }
  0xae   : > { %v2141_v5 = vpack.c.bf16 %v862_v3, %v861_v2  ;;  %s2462_s7 = smov [#allocation11]  }
  0xaf   : > { %v2231_v28 = vld [vmem:[%s3100_s10] sm:$0xff]   ;;  %v2232_v29 = vld [vmem:[%s3100_s10 + $0x8] sm:$0xff]  }
  0xb0   : > { %2142 = vmatprep.subr.bf16.mxu0 %v2141_v5  ;;  %2078 = vmatpush3.bf16.msra.mxu1 %v2231_v28 }
  0xb1   : > { %855 = vperm.xlu0 %2230, %v848_v4   ;;  %2144 = vmatpush3.bf16.msra.mxu0 %v2141_v5 }
  0xb2   : > { %2072 = vmatprep.subr.msk.mxu0 %vm871_vm0, %v863_v7  ;;  %2079 = vmatprep.subr.bf16.mxu1 %v2460_v6  ;;  %p3111_p3 = scmp.ne.s32.totalorder %s3109_s28, 0 }
  0xb3   : > { %s3102_s29 = smov %s3101_s27  ;;  %v2233_v4 = vld [vmem:[%s3101_s27 + $0x8] sm:$0xff]  }
  0xb4   : > { %2080 = vmatpush3.bf16.msra.mxu1 %v2232_v29  ;;  %v2234_v5 = vld [vmem:[%s3102_s29] sm:$0xff]   ;;  %v2235_v28 = vld [vmem:[%s3102_s29 + $0x10] sm:$0xff]  }
  0xb5   : > { %2073 = vmatpush3.msk.msra.mxu0 %vm871_vm0, %v863_v7  ;;  %2091 = vmatprep.subr.bf16.mxu1 %v2460_v6 }
  0xb6   : > { %2085 = vmatprep.subr.bf16.mxu0 %v2460_v6 }
 0x12c   : > { %v853_v10 = vpop.permute.xlu0 %852 }
 0x12d   : > { %vm857_vm2 = vcmp.eq.s32.totalorder %v853_v10, %v850_v9 }
 0x12e   : > { %v859_v11 = vsel %vm857_vm2, 1.0, %v2460_v6 }
 0x12f   : > { %2074 = vmatprep.mubr.msk.f32.mxu0 %vm864_vm1, %v859_v11 }
 0x130   : > { %v856_v12 = vpop.permute.xlu0 %855 }
 0x131   : > { %vm858_vm3 = vcmp.eq.s32.totalorder %v856_v12, %v850_v9 }
 0x132   : > { %v860_v13 = vsel %vm858_vm3, 1.0, %v2460_v6 }
 0x133   : > { %2075 = vmatmul.mubr.msk.f32.vlgmr.msra.gmra.mrb[0].mxu0 %vm864_vm1, %v860_v13 }
 0x134   : > { %2087 = vmatprep.mubr.msk.bf16.mxu0 %vm2461_vm5, %v2460_v6  ;;  %2086 = vmatpush3.bf16.msra.mxu0 %v2233_v4  ;;  %v2236_v4 = vld [vmem:[%s3022_s12] sm:$0xff]  }
 0x135   : > { %2097 = vmatprep.subr.bf16.mxu0 %v2460_v6 }
 0x206   : > { %v2787_v14 = vpop.f32.mrb[0].mxu0 }
 0x207   : > { %v2789_v15 = vpop.f32.mrb[1].mxu0  ;;  %v956_v17 = vsel %vm952_vm4, %v2787_v14, 0.0 }
 0x208   : > { %v953_v16 = vsel %vm952_vm4, %v2789_v15, 0.0 }
 0x209   : > { %954 = vadd.xlane.f32.xlu1 %v953_v16  ;;  %v1992_v16 = vld [vmem:[#allocation9] ss:$0 sm:$0xff] }
 0x20d   : > { %957 = vadd.xlane.f32.xlu1 %v956_v17 }
 0x296   : > { %v955_v18 = vpop.xlane.xlu1 %954 }
 0x297   : > { %v960_v19 = vmul.f32 0.03125, %v955_v18  ;;  %v1993_v18 = vld [vmem:[%s3103_s23] ss:$0 sm:$0xff]  ;;  %s2383_s23 = sshll.u32 %s2462_s7, 4  ;;  %s2384_s23 = int_to_ptr.vmem [resolvable:$false] %s2383_s23 }
 0x299   : > { %v962_v20 = vsub.f32 %v2789_v15, %v960_v19 }
 0x29a   : > { %v958_v21 = vpop.xlane.xlu1 %957 }
 0x29b   : > { %v961_v22 = vmul.f32 0.03125, %v958_v21  ;;  %v964_v23 = vmul.f32 %v962_v20, %v962_v20 }
 0x29d   : > { %v963_v24 = vsub.f32 %v2787_v14, %v961_v22  ;;  %v966_v25 = vsel %vm952_vm4, %v964_v23, 0.0 }
 0x29e   : > { %967 = vadd.xlane.f32.xlu0 %v966_v25 }
 0x29f   : > { %v965_v26 = vmul.f32 %v963_v24, %v963_v24 }
 0x2a1   : > { %v969_v27 = vsel %vm952_vm4, %v965_v26, 0.0 }
 0x2a2   : > { %970 = vadd.xlane.f32.xlu1 %v969_v27 }
 0x32b   : > { %v968_v30 = vpop.xlane.xlu0 %967 }
 0x32c   : > { %v972_v31 = vmul.f32 0.03125, %v968_v30 }
 0x32e   : > { %v974_v32 = vadd.f32 1e-05, %v972_v31 }
 0x32f   : > { %v971_v33 = vpop.xlane.xlu1 %970 }
 0x330   : > { %2243 = vrsqrt.f32 %v974_v32  ;;  %v973_v34 = vmul.f32 0.03125, %v971_v33 }
 0x332   : > { %v975_v35 = vadd.f32 1e-05, %v973_v34 }
 0x334   : > { %2245 = vrsqrt.f32 %v975_v35 }
 0x33a   : > { %v2244_v36 = vpop.eup %2243 }
 0x33b   : > { %v978_v38 = vmul.f32 %v2244_v36, %v962_v20 }
 0x33d   : > { %v986_v39 = vmul.f32 %v1986_v37, %v978_v38 }
 0x33e   : > { %v2246_v40 = vpop.eup %2245 }
 0x33f   : > { %v979_v42 = vmul.f32 %v2246_v40, %v963_v24  ;;  %v994_v44 = vadd.f32 %v1987_v41, %v986_v39 }
 0x341   : > { %v987_v43 = vmul.f32 %v1986_v37, %v979_v42  ;;  %v996_v46 = vmax.f32 %v994_v44, 0.0 }
 0x343   : > { %v995_v45 = vadd.f32 %v1987_v41, %v987_v43 }
 0x345   : > { %v997_v47 = vmax.f32 %v995_v45, 0.0 }
 0x347   : > { %v998_v48 = vpack.c.bf16 %v997_v47, %v996_v46 }
 0x349   : > { %2082 = vmatmul.mubr.msk.bf16.vlgmr.msra.gmra.mrb[0].mxu1 %vm952_vm4, %v998_v48  ;;  %v2004_v48 = vld [vmem:[%s3104_s30] ss:$0 sm:$0xff]  ;;  %s3106_s30 = sld [smem:[#allocation34_spill]] }
 0x34a   : > { %2093 = vmatprep.mubr.msk.bf16.mxu1 %vm2461_vm5, %v2460_v6  ;;  %2092 = vmatpush3.bf16.msra.mxu1 %v2234_v5 }
 0x34b   : > { %2103 = vmatprep.subr.bf16.mxu1 %v2460_v6 }
 0x41c   : > { %v1059_v50 = vpop.f32.mrb[0].mxu1 }
 0x41d   : > { %v1060_v51 = vadd.f32 %v1988_v49, %v1059_v50  ;;  %v2083_v52 = vpop.f32.mrb[1].mxu1 }
 0x41e   : > { %v1062_v53 = vpop.f32.mrb[2].mxu1 }
 0x41f   : > { %v1063_v54 = vadd.f32 %v1988_v49, %v1062_v53  ;;  %v2084_v55 = vpop.f32.mrb[3].mxu1  ;;  %v1068_v56 = vsel %vm842_vm6, %v1060_v51, 0.0 }
 0x420   : > { %1069 = vadd.xlane.f32.xlu1 %v1068_v56 }
 0x421   : > { %v1071_v57 = vsel %vm842_vm6, %v1063_v54, 0.0 }
 0x424   : > { %1072 = vadd.xlane.f32.xlu1 %v1071_v57 }
 0x4ad   : > { %v1070_v58 = vpop.xlane.xlu1 %1069 }
 0x4ae   : > { %v1075_v59 = vmul.f32 0.0625, %v1070_v58 }
 0x4b0   : > { %v1077_v60 = vsub.f32 %v1060_v51, %v1075_v59 }
 0x4b1   : > { %v1073_v61 = vpop.xlane.xlu1 %1072 }
 0x4b2   : > { %v1076_v62 = vmul.f32 0.0625, %v1073_v61  ;;  %v1079_v63 = vmul.f32 %v1077_v60, %v1077_v60 }
 0x4b4   : > { %v1078_v0 = vsub.f32 %v1063_v54, %v1076_v62  ;;  %v1081_v1 = vsel %vm842_vm6, %v1079_v63, 0.0 }
 0x4b5   : > { %1082 = vadd.xlane.f32.xlu1 %v1081_v1 }
 0x4b6   : > { %v1080_v2 = vmul.f32 %v1078_v0, %v1078_v0 }
 0x4b8   : > { %v1084_v3 = vsel %vm842_vm6, %v1080_v2, 0.0 }
 0x4b9   : > { %1085 = vadd.xlane.f32.xlu1 %v1084_v3 }
 0x542   : > { %v1083_v7 = vpop.xlane.xlu1 %1082 }
 0x543   : > { %v1087_v8 = vmul.f32 0.0625, %v1083_v7 }
 0x545   : > { %v1089_v9 = vadd.f32 1e-05, %v1087_v8 }
 0x546   : > { %v1086_v10 = vpop.xlane.xlu1 %1085 }
 0x547   : > { %2247 = vrsqrt.f32 %v1089_v9  ;;  %v1088_v11 = vmul.f32 0.0625, %v1086_v10 }
 0x549   : > { %v1090_v12 = vadd.f32 1e-05, %v1088_v11 }
 0x54b   : > { %2249 = vrsqrt.f32 %v1090_v12 }
 0x551   : > { %v2248_v13 = vpop.eup %2247 }
 0x552   : > { %v1093_v17 = vmul.f32 %v2248_v13, %v1077_v60  ;;  %v2005_v13 = vld [vmem:[%s3105_s6] ss:$0 sm:$0xff]  ;;  %s1980_s6 = sshll.u32 %s833_s0, 4 }
 0x553   : > { %s835_s4 = scalar_lea.vmem [#allocation11], %s1980_s6 }
 0x554   : > { %v1101_v19 = vmul.f32 %v1992_v16, %v1093_v17 }
 0x555   : > { %v2250_v20 = vpop.eup %2249 }
 0x556   : > { %v1109_v21 = vadd.f32 %v1993_v18, %v1101_v19  ;;  %v1094_v22 = vmul.f32 %v2250_v20, %v1078_v0  ;;  %v2006_v19 = vld [vmem:[%s3021_s11] ss:$0 sm:$0xff] }
 0x558   : > { %v1111_v23 = vmax.f32 %v1109_v21, 0.0  ;;  %v1102_v24 = vmul.f32 %v1992_v16, %v1094_v22 }
 0x55a   : > { %1113 = vst.msk [vmem:[#allocation2 + $0x2] sm:$0xff] %vm842_vm6, %v1111_v23  ;;  %v1110_v25 = vadd.f32 %v1993_v18, %v1102_v24 }
 0x55c   : > { %v1112_v26 = vmax.f32 %v1110_v25, 0.0 }
 0x55e   : > { %1114 = vst.msk [vmem:[#allocation2 + $0xa] sm:$0xff] %vm842_vm6, %v1112_v26 }
 0x561   : > { %v1118_v27 = vld [vmem:[#allocation2 + $0x2] sm:$0xff] }
 0x562   : > { %v1115_v30 = vld [vmem:[#allocation2 + $0x1] sm:$0xff] }
 0x565   : > { %v1119_v29 = vld [vmem:[#allocation2 + $0xa] sm:$0xff] }
 0x566   : > { %v1116_v31 = vld [vmem:[#allocation2 + $0x9] sm:$0xff]  ;;  %v1120_v32 = vpack.c.bf16 %v1119_v29, %v1118_v27  ;;  %v2007_v27 = vld [vmem:[%s3023_s13] ss:$0 sm:$0xff] }
 0x567   : > { %v1117_v33 = vpack.c.bf16 %v1116_v31, %v1115_v30  ;;  %v1121_v34 = vld [vmem:[#allocation2 + $0x3] sm:$0xff]  ;;  %v1122_v35 = vld [vmem:[#allocation2 + $0xb] sm:$0xff] }
 0x568   : > { %2088 = vmatmul.mubr.msk.bf16.vlgmr.msra.gmra.mrb[4].mxu0 %vm842_vm6, %v1120_v32  ;;  %v1123_v36 = vpack.c.bf16 %v1122_v35, %v1121_v34 }
 0x569   : > { %2094 = vmatmul.mubr.msk.bf16.vlgmr.msra.gmra.mrb[4].mxu1 %vm842_vm6, %v1117_v33  ;;  %2098 = vmatpush3.bf16.msra.mxu0 %v2235_v28 }
 0x56a   : > { %2099 = vmatprep.mubr.msk.bf16.mxu0 %vm2461_vm5, %v2460_v6  ;;  %2105 = vmatprep.mubr.msk.bf16.mxu1 %vm2461_vm5, %v2460_v6 }
 0x56b   : > { %2109 = vmatprep.subr.bf16.mxu0 %v2460_v6  ;;  %2104 = vmatpush3.bf16.msra.mxu1 %v2236_v4 }
 0x56c   : > { %2117 = vmatprep.subr.bf16.mxu1 %v2460_v6 }
 0x570   : > { %2100 = vmatmul.mubr.msk.bf16.vlgmr.msra.gmra.mrb[8].mxu0 %vm842_vm6, %v1123_v36 }
 0x571   : > { %2113 = vmatprep.mubr.msk.bf16.mxu0 %vm2461_vm5, %v2460_v6 }
 0x63b   : > { %v1172_v37 = vpop.f32.mrb[4].mxu0 }
 0x63c   : > { %v1222_v38 = vpop.f32.mrb[4].mxu1  ;;  %v2089_v40 = vpop.f32.mrb[5].mxu0 }
 0x63d   : > { %v1223_v39 = vadd.f32 %v1222_v38, %v1172_v37  ;;  %v2095_v41 = vpop.f32.mrb[5].mxu1  ;;  %v1175_v42 = vpop.f32.mrb[6].mxu0 }
 0x63e   : > { %v1225_v43 = vpop.f32.mrb[6].mxu1  ;;  %v2090_v45 = vpop.f32.mrb[7].mxu0 }
 0x63f   : > { %v1226_v44 = vadd.f32 %v1225_v43, %v1175_v42  ;;  %v2096_v46 = vpop.f32.mrb[7].mxu1 }
 0x640   : > { %v2237_v46 = vld [vmem:[%s3026_s16] sm:$0xff]  }
 0x641   : > { %2110 = vmatpush3.bf16.msra.mxu0 %v2237_v46  ;;  %v2241_v46 = vld [vmem:[%s3030_s20 + $0x10] sm:$0xff]  }
 0x642   : > { %2111 = vmatprep.subr.bf16.mxu0 %v2460_v6 }
 0x643   : > { %v1275_v47 = vpop.f32.mrb[8].mxu0 }
 0x644   : > { %v1282_v49 = vadd.f32 %v1275_v47, %v1223_v39  ;;  %v2101_v50 = vpop.f32.mrb[9].mxu0  ;;  %v2238_v47 = vld [vmem:[%s3026_s16 + $0x8] sm:$0xff]  }
 0x645   : > { %v1278_v51 = vpop.f32.mrb[10].mxu0  ;;  %2112 = vmatpush3.bf16.msra.mxu0 %v2238_v47 }
 0x646   : > { %v1283_v52 = vadd.f32 %v1278_v51, %v1226_v44  ;;  %v2102_v53 = vpop.f32.mrb[11].mxu0  ;;  %v1291_v54 = vadd.f32 %v2004_v48, %v1282_v49  ;;  %2123 = vmatprep.subr.bf16.mxu0 %v2460_v6 }
 0x648   : > { %v1295_v55 = vsel %vm842_vm6, %v1291_v54, 0.0  ;;  %v1292_v56 = vadd.f32 %v2004_v48, %v1283_v52 }
 0x649   : > { %1296 = vadd.xlane.f32.xlu1 %v1295_v55  ;;  %v2010_v55 = vld [vmem:[%s3024_s14] ss:$0 sm:$0xff] }
 0x64a   : > { %v1298_v57 = vsel %vm842_vm6, %v1292_v56, 0.0 }
 0x64d   : > { %1299 = vadd.xlane.f32.xlu1 %v1298_v57 }
 0x6d6   : > { %v1297_v58 = vpop.xlane.xlu1 %1296 }
 0x6d7   : > { %v1301_v59 = vmul.f32 0.0625, %v1297_v58  ;;  %v2011_v58 = vld [vmem:[%s3025_s15] ss:$0 sm:$0xff] }
 0x6d9   : > { %v1303_v60 = vsub.f32 %v1291_v54, %v1301_v59 }
 0x6da   : > { %v1300_v61 = vpop.xlane.xlu1 %1299 }
 0x6db   : > { %v1302_v62 = vmul.f32 0.0625, %v1300_v61  ;;  %v1305_v63 = vmul.f32 %v1303_v60, %v1303_v60 }
 0x6dd   : > { %v1304_v0 = vsub.f32 %v1292_v56, %v1302_v62  ;;  %v1307_v1 = vsel %vm842_vm6, %v1305_v63, 0.0 }
 0x6de   : > { %1308 = vadd.xlane.f32.xlu1 %v1307_v1 }
 0x6df   : > { %v1306_v2 = vmul.f32 %v1304_v0, %v1304_v0 }
 0x6e1   : > { %v1310_v3 = vsel %vm842_vm6, %v1306_v2, 0.0 }
 0x6e2   : > { %1311 = vadd.xlane.f32.xlu0 %v1310_v3  ;;  %v2012_v3 = vld [vmem:[%s3027_s17] ss:$0 sm:$0xff] }
 0x76b   : > { %v1309_v5 = vpop.xlane.xlu1 %1308 }
 0x76c   : > { %v1313_v7 = vmul.f32 0.0625, %v1309_v5 }
 0x76e   : > { %v1315_v8 = vadd.f32 1e-05, %v1313_v7 }
 0x76f   : > { %v1312_v9 = vpop.xlane.xlu0 %1311 }
 0x770   : > { %2251 = vrsqrt.f32 %v1315_v8  ;;  %v1314_v10 = vmul.f32 0.0625, %v1312_v9 }
 0x772   : > { %v1316_v11 = vadd.f32 1e-05, %v1314_v10 }
 0x774   : > { %2253 = vrsqrt.f32 %v1316_v11 }
 0x77a   : > { %v2252_v12 = vpop.eup %2251 }
 0x77b   : > { %v1319_v16 = vmul.f32 %v2252_v12, %v1303_v60 }
 0x77d   : > { %v1327_v17 = vmul.f32 %v2005_v13, %v1319_v16 }
 0x77e   : > { %v2254_v18 = vpop.eup %2253 }
 0x77f   : > { %v1320_v20 = vmul.f32 %v2254_v18, %v1304_v0  ;;  %v1335_v22 = vadd.f32 %v2006_v19, %v1327_v17 }
 0x781   : > { %v1328_v21 = vmul.f32 %v2005_v13, %v1320_v20  ;;  %v1337_v24 = vmax.f32 %v1335_v22, 0.0 }
 0x783   : > { %v1336_v23 = vadd.f32 %v2006_v19, %v1328_v21 }
 0x785   : > { %v1338_v25 = vmax.f32 %v1336_v23, 0.0 }
 0x787   : > { %v1339_v26 = vpack.c.bf16 %v1338_v25, %v1337_v24  ;;  %v2239_v25 = vld [vmem:[%s3030_s20 + $0x8] sm:$0xff]  }
 0x789   : > { %2106 = vmatmul.mubr.msk.bf16.vlgmr.msra.gmra.mrb[8].mxu1 %vm842_vm6, %v1339_v26  ;;  %v2240_v26 = vld [vmem:[%s3030_s20] sm:$0xff]  }
 0x78a   : > { %2119 = vmatprep.mubr.msk.bf16.mxu1 %vm2461_vm5, %v2460_v6  ;;  %2118 = vmatpush3.bf16.msra.mxu1 %v2239_v25 }
 0x78b   : > { %2129 = vmatprep.subr.bf16.mxu1 %v2460_v6 }
 0x85c   : > { %v1392_v28 = vpop.f32.mrb[8].mxu1 }
 0x85d   : > { %v1393_v29 = vadd.f32 %v2007_v27, %v1392_v28  ;;  %v2107_v30 = vpop.f32.mrb[9].mxu1 }
 0x85e   : > { %v1395_v31 = vpop.f32.mrb[10].mxu1 }
 0x85f   : > { %v2873_v32 = vadd.f32 %v1393_v29, %v2789_v15  ;;  %v1396_v33 = vadd.f32 %v2007_v27, %v1395_v31  ;;  %v2108_v34 = vpop.f32.mrb[11].mxu1 }
 0x861   : > { %v2876_v35 = vadd.f32 %v2787_v14, %v1396_v33  ;;  %v1403_v36 = vsel %vm952_vm4, %v2873_v32, 0.0 }
 0x862   : > { %1404 = vadd.xlane.f32.xlu1 %v1403_v36  ;;  %v2016_v36 = vld [vmem:[%s3028_s18] ss:$0 sm:$0xff] }
 0x863   : > { %v1406_v37 = vsel %vm952_vm4, %v2876_v35, 0.0 }
 0x864   : > { %1407 = vadd.xlane.f32.xlu0 %v1406_v37 }
 0x8ef   : > { %v1405_v38 = vpop.xlane.xlu1 %1404 }
 0x8f0   : > { %v1409_v39 = vmul.f32 0.03125, %v1405_v38 }
 0x8f1   : > { %v1408_v40 = vpop.xlane.xlu0 %1407 }
 0x8f2   : > { %v1411_v41 = vsub.f32 %v2873_v32, %v1409_v39  ;;  %v1410_v15 = vmul.f32 0.03125, %v1408_v40  ;;  %v2017_v39 = vld [vmem:[%s3029_s19] ss:$0 sm:$0xff] }
 0x8f4   : > { %v1412_v42 = vsub.f32 %v2876_v35, %v1410_v15  ;;  %v1413_v43 = vmul.f32 %v1411_v41, %v1411_v41 }
 0x8f6   : > { %v1415_v14 = vsel %vm952_vm4, %v1413_v43, 0.0  ;;  %v1414_v44 = vmul.f32 %v1412_v42, %v1412_v42 }
 0x8f7   : > { %1416 = vadd.xlane.f32.xlu1 %v1415_v14 }
 0x8f8   : > { %v1418_v45 = vsel %vm952_vm4, %v1414_v44, 0.0 }
 0x8f9   : > { %1419 = vadd.xlane.f32.xlu0 %v1418_v45 }
 0x984   : > { %v1417_v48 = vpop.xlane.xlu1 %1416 }
 0x985   : > { %v1421_v49 = vmul.f32 0.03125, %v1417_v48 }
 0x986   : > { %v1420_v50 = vpop.xlane.xlu0 %1419 }
 0x987   : > { %v1423_v51 = vadd.f32 1e-05, %v1421_v49  ;;  %v1422_v52 = vmul.f32 0.03125, %v1420_v50 }
 0x989   : > { %2255 = vrsqrt.f32 %v1423_v51  ;;  %v1424_v53 = vadd.f32 1e-05, %v1422_v52 }
 0x98b   : > { %2257 = vrsqrt.f32 %v1424_v53 }
 0x993   : > { %v2256_v54 = vpop.eup %2255 }
 0x994   : > { %v1427_v56 = vmul.f32 %v2256_v54, %v1411_v41 }
 0x995   : > { %v2258_v57 = vpop.eup %2257 }
 0x996   : > { %v1435_v59 = vmul.f32 %v2010_v55, %v1427_v56  ;;  %v1428_v60 = vmul.f32 %v2258_v57, %v1412_v42 }
 0x998   : > { %v1436_v61 = vmul.f32 %v2010_v55, %v1428_v60  ;;  %v1443_v62 = vadd.f32 %v2011_v58, %v1435_v59 }
 0x99a   : > { %v1444_v63 = vadd.f32 %v2011_v58, %v1436_v61  ;;  %v1445_v0 = vmax.f32 %v1443_v62, 0.0 }
 0x99c   : > { %v1446_v1 = vmax.f32 %v1444_v63, 0.0 }
 0x99e   : > { %v1447_v2 = vpack.c.bf16 %v1446_v1, %v1445_v0 }
 0x9a0   : > { %2114 = vmatmul.mubr.msk.bf16.vlgmr.msra.gmra.mrb[12].mxu0 %vm952_vm4, %v1447_v2 }
 0x9a1   : > { %2125 = vmatprep.mubr.msk.bf16.mxu0 %vm2461_vm5, %v2460_v6  ;;  %2124 = vmatpush3.bf16.msra.mxu0 %v2240_v26 }
 0x9a2   : > { %2135 = vmatprep.subr.bf16.mxu0 %v2460_v6 }
 0xa73   : > { %v1508_v4 = vpop.f32.mrb[12].mxu0 }
 0xa74   : > { %v1509_v5 = vadd.f32 %v2012_v3, %v1508_v4  ;;  %v2115_v7 = vpop.f32.mrb[13].mxu0 }
 0xa75   : > { %v1511_v8 = vpop.f32.mrb[14].mxu0 }
 0xa76   : > { %v1512_v9 = vadd.f32 %v2012_v3, %v1511_v8  ;;  %v2116_v10 = vpop.f32.mrb[15].mxu0  ;;  %v1517_v11 = vsel %vm842_vm6, %v1509_v5, 0.0 }
 0xa77   : > { %1518 = vadd.xlane.f32.xlu1 %v1517_v11 }
 0xa78   : > { %v1520_v12 = vsel %vm842_vm6, %v1512_v9, 0.0 }
 0xa79   : > { %1521 = vadd.xlane.f32.xlu0 %v1520_v12 }
 0xb04   : > { %v1519_v13 = vpop.xlane.xlu1 %1518 }
 0xb05   : > { %v1523_v16 = vmul.f32 0.0625, %v1519_v13 }
 0xb06   : > { %v1522_v17 = vpop.xlane.xlu0 %1521 }
 0xb07   : > { %v1525_v18 = vsub.f32 %v1509_v5, %v1523_v16  ;;  %v1524_v19 = vmul.f32 0.0625, %v1522_v17 }
 0xb09   : > { %v1526_v20 = vsub.f32 %v1512_v9, %v1524_v19  ;;  %v1527_v21 = vmul.f32 %v1525_v18, %v1525_v18 }
 0xb0b   : > { %v1529_v22 = vsel %vm842_vm6, %v1527_v21, 0.0  ;;  %v1528_v23 = vmul.f32 %v1526_v20, %v1526_v20 }
 0xb0c   : > { %1530 = vadd.xlane.f32.xlu1 %v1529_v22 }
 0xb0d   : > { %v1532_v24 = vsel %vm842_vm6, %v1528_v23, 0.0 }
 0xb0e   : > { %1533 = vadd.xlane.f32.xlu0 %v1532_v24  ;;  %v2242_v24 = vld [vmem:[%s3034_s24] sm:$0xff]  }
 0xb99   : > { %v1531_v27 = vpop.xlane.xlu1 %1530 }
 0xb9a   : > { %v1535_v28 = vmul.f32 0.0625, %v1531_v27 }
 0xb9b   : > { %v1534_v29 = vpop.xlane.xlu0 %1533 }
 0xb9c   : > { %v1537_v30 = vadd.f32 1e-05, %v1535_v28  ;;  %v1536_v31 = vmul.f32 0.0625, %v1534_v29 }
 0xb9e   : > { %2259 = vrsqrt.f32 %v1537_v30  ;;  %v1538_v33 = vadd.f32 1e-05, %v1536_v31 }
 0xba0   : > { %2261 = vrsqrt.f32 %v1538_v33  ;;  %v2029_v33 = vld [vmem:[%s3106_s30] ss:$0 sm:$0xff]  ;;  %s1865_s30 = sshll.u32 %s835_s4, 4  ;;  %s2964_s30 = int_to_ptr.vmem [resolvable:$true] %s1865_s30 }
 0xba1   : > { %s2379_s6 = scalar_lea.vmem %s2964_s30, 256  ;;  %p2386_p8 = scmp.lt.s32.totalorder %s2964_s30, %s2384_s23 }
 0xba2   : > { %p2380_p2 = scmp.ne.s32.totalorder %s2964_s30, %s2379_s6 }
 0xba4   : > { %p2381_p4 = pnand %p2380_p2, %p3111_p3 }
 0xba6   : > { %p2382_p7 = pneg %p2381_p4 }
 0xba8   : > { %v2260_v34 = vpop.eup %2259 }
 0xba9   : > { %v1541_v37 = vmul.f32 %v2260_v34, %v1525_v18 }
 0xbaa   : > { %v2262_v38 = vpop.eup %2261 }
 0xbab   : > { %v1549_v40 = vmul.f32 %v2016_v36, %v1541_v37  ;;  %v1542_v41 = vmul.f32 %v2262_v38, %v1526_v20  ;;  %v2030_v37 = vld [vmem:[%s3107_s1] ss:$0 sm:$0xff]  ;;  %s3110_s1 = sld [smem:[#allocation37_spill]] }
 0xbad   : > { %v1557_v15 = vadd.f32 %v2017_v39, %v1549_v40  ;;  %v1550_v42 = vmul.f32 %v2016_v36, %v1542_v41 }
 0xbaf   : > { %v1559_v43 = vmax.f32 %v1557_v15, 0.0  ;;  %v1558_v14 = vadd.f32 %v2017_v39, %v1550_v42 }
 0xbb1   : > { %1561 = vst.msk [vmem:[#allocation2 + $0x2] sm:$0xff] %vm842_vm6, %v1559_v43  ;;  %v1560_v44 = vmax.f32 %v1558_v14, 0.0  ;;  %s2962_s2 = scalar_lea.hbm %s3110_s1, %s2040_s9 }
 0xbb3   : > { %1562 = vst.msk [vmem:[#allocation2 + $0xa] sm:$0xff] %vm842_vm6, %v1560_v44  ;;  %v2031_v44 = vld [vmem:[%s3108_s25] ss:$0 sm:$0xff]  ;;  %s2385_s25 = scalar_lea.vmem %s2384_s23, 512 }
 0xbb4   : > { %p2387_p11 = scmp.lt.s32.totalorder %s2385_s25, %s2379_s6 }
 0xbb6   : > { %p2388_p13 = por %p2387_p11, %p2386_p8 }
 0xbb8   : > { %v1566_v45 = vld [vmem:[#allocation2 + $0x2] sm:$0xff]  ;;  %p2389_p1 = pnand %p2388_p13, %p2382_p7 }
 0xbb9   : > { %v1563_v48 = vld [vmem:[#allocation2] sm:$0xff] }
 0xbba   : > { %v1567_v47 = vld [vmem:[#allocation2 + $0xa] sm:$0xff] }
 0xbbb   : > { %v1564_v49 = vld [vmem:[#allocation2 + $0x8] sm:$0xff]  ;;  %v1568_v50 = vpack.c.bf16 %v1567_v47, %v1566_v45 }
 0xbbc   : > { %v1565_v51 = vpack.c.bf16 %v1564_v49, %v1563_v48  ;;  %v1569_v52 = vld [vmem:[#allocation2 + $0x4] sm:$0xff]  ;;  %v1570_v53 = vld [vmem:[#allocation2 + $0xc] sm:$0xff] }
 0xbbd   : > { %2120 = vmatmul.mubr.msk.bf16.vlgmr.msra.gmra.mrb[12].mxu1 %vm842_vm6, %v1568_v50  ;;  %v1571_v54 = vpack.c.bf16 %v1570_v53, %v1569_v52 }
 0xbbe   : > { %2126 = vmatmul.mubr.msk.bf16.vlgmr.msra.gmra.mrb[16].mxu0 %vm842_vm6, %v1565_v51  ;;  %2130 = vmatpush3.bf16.msra.mxu1 %v2241_v46 }
 0xbbf   : > { %2131 = vmatprep.mubr.msk.bf16.mxu1 %vm2461_vm5, %v2460_v6  ;;  %2137 = vmatprep.mubr.msk.bf16.mxu0 %vm2461_vm5, %v2460_v6  ;;  %v2028_v6 = vld [vmem:[%s3031_s21] ss:$0 sm:$0xff] }
 0xbc0   : > { %2136 = vmatpush3.bf16.msra.mxu0 %v2242_v24 }
 0xbc5   : > { %2132 = vmatmul.mubr.msk.bf16.vlgmr.msra.gmra.mrb[16].mxu1 %vm842_vm6, %v1571_v54 }
 0xc90   : > { %v1620_v55 = vpop.f32.mrb[12].mxu1 }
 0xc91   : > { %v1670_v56 = vpop.f32.mrb[16].mxu0  ;;  %v2121_v58 = vpop.f32.mrb[13].mxu1 }
 0xc92   : > { %v1671_v57 = vadd.f32 %v1670_v56, %v1620_v55  ;;  %v2127_v59 = vpop.f32.mrb[17].mxu0  ;;  %v1623_v60 = vpop.f32.mrb[14].mxu1 }
 0xc93   : > { %v1673_v61 = vpop.f32.mrb[18].mxu0  ;;  %v2122_v63 = vpop.f32.mrb[15].mxu1 }
 0xc94   : > { %v1674_v62 = vadd.f32 %v1673_v61, %v1623_v60  ;;  %v2128_v0 = vpop.f32.mrb[19].mxu0 }
 0xc98   : > { %v1723_v1 = vpop.f32.mrb[16].mxu1 }
 0xc99   : > { %v1730_v2 = vadd.f32 %v1723_v1, %v1671_v57  ;;  %v2133_v3 = vpop.f32.mrb[17].mxu1 }
 0xc9a   : > { %v1726_v4 = vpop.f32.mrb[18].mxu1 }
 0xc9b   : > { %v1731_v5 = vadd.f32 %v1726_v4, %v1674_v62  ;;  %v2134_v7 = vpop.f32.mrb[19].mxu1  ;;  %v1739_v8 = vadd.f32 %v2028_v6, %v1730_v2 }
 0xc9d   : > { %v1743_v9 = vsel %vm842_vm6, %v1739_v8, 0.0  ;;  %v1740_v10 = vadd.f32 %v2028_v6, %v1731_v5 }
 0xc9e   : > { %1744 = vadd.xlane.f32.xlu1 %v1743_v9 }
 0xc9f   : > { %v1746_v11 = vsel %vm842_vm6, %v1740_v10, 0.0 }
 0xca0   : > { %1747 = vadd.xlane.f32.xlu0 %v1746_v11 }
 0xd2b   : > { %v1745_v12 = vpop.xlane.xlu1 %1744 }
 0xd2c   : > { %v1749_v13 = vmul.f32 0.0625, %v1745_v12 }
 0xd2d   : > { %v1748_v16 = vpop.xlane.xlu0 %1747 }
 0xd2e   : > { %v1751_v17 = vsub.f32 %v1739_v8, %v1749_v13  ;;  %v1750_v18 = vmul.f32 0.0625, %v1748_v16 }
 0xd30   : > { %v1752_v19 = vsub.f32 %v1740_v10, %v1750_v18  ;;  %v1753_v20 = vmul.f32 %v1751_v17, %v1751_v17 }
 0xd32   : > { %v1755_v21 = vsel %vm842_vm6, %v1753_v20, 0.0  ;;  %v1754_v22 = vmul.f32 %v1752_v19, %v1752_v19 }
 0xd33   : > { %1756 = vadd.xlane.f32.xlu1 %v1755_v21 }
 0xd34   : > { %v1758_v23 = vsel %vm842_vm6, %v1754_v22, 0.0 }
 0xd35   : > { %1759 = vadd.xlane.f32.xlu0 %v1758_v23 }
 0xdc0   : > { %v1757_v25 = vpop.xlane.xlu1 %1756 }
 0xdc1   : > { %v1761_v26 = vmul.f32 0.0625, %v1757_v25 }
 0xdc2   : > { %v1760_v27 = vpop.xlane.xlu0 %1759 }
 0xdc3   : > { %v1763_v28 = vadd.f32 1e-05, %v1761_v26  ;;  %v1762_v29 = vmul.f32 0.0625, %v1760_v27 }
 0xdc5   : > { %2263 = vrsqrt.f32 %v1763_v28  ;;  %v1764_v30 = vadd.f32 1e-05, %v1762_v29 }
 0xdc7   : > { %2265 = vrsqrt.f32 %v1764_v30 }
 0xdcf   : > { %v2264_v31 = vpop.eup %2263 }
 0xdd0   : > { %v1767_v34 = vmul.f32 %v2264_v31, %v1751_v17 }
 0xdd1   : > { %v2266_v36 = vpop.eup %2265 }
 0xdd2   : > { %v1775_v38 = vmul.f32 %v2029_v33, %v1767_v34  ;;  %v1768_v39 = vmul.f32 %v2266_v36, %v1752_v19 }
 0xdd4   : > { %v1776_v40 = vmul.f32 %v2029_v33, %v1768_v39  ;;  %v1783_v41 = vadd.f32 %v2030_v37, %v1775_v38 }
 0xdd6   : > { %v1784_v15 = vadd.f32 %v2030_v37, %v1776_v40  ;;  %v1785_v42 = vmax.f32 %v1783_v41, 0.0 }
 0xdd8   : > { %v1786_v43 = vmax.f32 %v1784_v15, 0.0 }
 0xdda   : > { %v1787_v14 = vpack.c.bf16 %v1786_v43, %v1785_v42 }
 0xddc   : > { %2138 = vmatmul.mubr.msk.bf16.vlgmr.msra.gmra.mrb[20].mxu0 %vm842_vm6, %v1787_v14 }
 0xeaf   : > { %v1840_v45 = vpop.f32.mrb[20].mxu0 }
 0xeb0   : > { %v1841_v46 = vadd.f32 %v2031_v44, %v1840_v45  ;;  %v2139_v47 = vpop.f32.mrb[21].mxu0 }
 0xeb1   : > { %v1843_v48 = vpop.f32.mrb[22].mxu0 }
 0xeb2   : > { %v1847_v49 = vadd.f32 %v1841_v46, %v2873_v32  ;;  %v1844_v50 = vadd.f32 %v2031_v44, %v1843_v48  ;;  %v2140_v51 = vpop.f32.mrb[23].mxu0 }
 0xeb4   : > { %1849 = vst.msk [vmem:[%s835_s4] sm:$0xff] %vm952_vm4, %v1847_v49  ;;  %v1848_v52 = vadd.f32 %v1844_v50, %v2876_v35 }
 0xeb6   : > { %1850 = vst.msk [vmem:[%s835_s4 + $0x8] sm:$0xff] %vm952_vm4, %v1848_v52 }
 0xeb7   : > { %2392 = shalt.err (!%p2389_p1)
}
 0xeb8   : > { %s2393_s0 = scalar_lea.hbm %s2962_s2, 256  ;;  %s2397_s5 = scalar_lea.hbm %s3110_s1, 512 }
 0xeb9   : > { %p2394_p0 = scmp.ne.s32.totalorder %s2962_s2, %s2393_s0  ;;  %p2398_p9 = scmp.lt.u32.totalorder %s2962_s2, %s3110_s1 }
 0xeba   : > { %p2399_p12 = scmp.lt.u32.totalorder %s2397_s5, %s2393_s0  ;;  %p2401_p2 = scmp.lt.u32.totalorder %s2393_s0, %s2962_s2 }
 0xebb   : > { %p2395_p6 = pnand %p2394_p0, %p3111_p3 }
 0xebc   : > { %p2400_p10 = por %p2399_p12, %p2398_p9 }
 0xebd   : > { %p2396_p5 = pneg %p2395_p6 }
 0xebe   : > { %p2402_p4 = por %p2401_p2, %p2400_p10 }
 0xec0   : > { %p2403_p7 = pnand %p2402_p4, %p2396_p5 }
 0xec2   : > { %2406 = shalt.err (!%p2403_p7)
}
 0xec3   : > { %s2463_s6 = smov 128   ;;  %s2464_s23 = smov 8  }
 0xec4   : > { %2161 = dma.vmem_to_hbm [thread:$0]  (%p3111_p3), %s2964_s30, 256, %s2962_s2, %s2969_s8, %s2463_s6, %s2463_s6, %s2464_s23  }
 0xec5 PF: > { %s3112_s25 = sld [smem:[#allocation18_spill]]  ;;  %s3113_s9 = sld [smem:[#allocation16_spill]] }
 0xec6   : > { %s3114_s4 = sld [smem:[#allocation22_spill]] }
 0xecb   : > { %p2188_p8 = scmp.ge.s32.totalorder %s3112_s25, 2  ;;  %s1880_s27 = sand.u32 1, %s3113_s9  }
 0xecc   : > { %p3115_p11 = scmp.ne.s32.totalorder %s3114_s4, 0  ;;  %s1881_s0 = scalar_lea.sflag [#allocation5], %s1880_s27 }
 0xece   : > { %p2177_p13 = pnand %p2188_p8, %p3115_p11 }
 0xed0   : > { %2436 = dma.done.wait (!%p2177_p13), %s1881_s0, 256  }
 0xed1   : > { %2438 = vsyncadd (!%p2177_p13), %s1881_s0, 4294967040  ;;  %s3116_s28 = sld [smem:[#allocation19_spill]]  ;;  %s3117_s5 = sld [smem:[#allocation17_spill]] }
 0xed2   : > { %s3118_s7 = sld [smem:[#allocation20_spill]]  ;;  %s3119_s27 = smov %s2445_s3 }
 0xed7   : > { %p39_p1 = scmp.ge.s32.totalorder %s3116_s28, 4   ;;  %s3120_s3 = smov %s3117_s5 }
 0xed9   :  { %41 = sbr.rel (!%p39_p1) target bundleno = 22 (0x16), region = 180 }
 0xee0   :  { %1886 = vsyncpa [#allocation4], 1 }
 0xee1   :  { %1888 = vsyncpa [#allocation4 + $0x1], 1 }
 0xee2   :  { %1889 = vsyncpa [#allocation7], 1 }
 0xee3   :  { %1890 = vsyncpa [#allocation10], 1 }
 0xee4   :  { %1891 = vsyncpa [#allocation5], 1 }
 0xee5   :  { %1893 = vsyncpa [#allocation5 + $0x1], 1 }

</bundles_post_ra>
